<compile_context>
chip_gen: v5e
topology: v5e:2x2
jax: 0.10.0
libtpu: 0.0.40
codegen_flags: <defaults>
</compile_context>

<pallas_src>
import functools

import jax
import jax.numpy as jnp
from jax import lax
from jax.experimental import pallas as pl
from jax.experimental.pallas import tpu as pltpu


def _round_up(x, m):
    return ((x + m - 1) // m) * m


def _cdiv(a, b):
    return (a + b - 1) // b


_VMEM_LIMIT_BYTES = 40 * 1024 * 1024      # safe on v5e/v6e (128 MiB) and v7x (64 MiB)
_CONV_VMEM_BUDGET = 8 * 1024 * 1024       # per-buffer cap for the conv input tile
_POOL_BLOCK_BYTES = 512 * 1024            # target bf16 input bytes per pooling block


# ----------------------------- Pallas kernels ------------------------------ #

def _conv_stats_kernel(p_ref, w_ref, y_ref, stats_ref, *, rows_total, tile_r):
    """One M-tile of the packed im2col matmul (bf16 x bf16 -> f32 on the MXU),
    bf16 writeback, plus per-tile per-lane sum / sum-of-squares for BatchNorm."""
    y = jnp.dot(p_ref[...], w_ref[...], preferred_element_type=jnp.float32)
    y_ref[...] = y.astype(y_ref.dtype)
    if rows_total % tile_r != 0:
        # Mask rows of the (only) partial edge tile out of the statistics.
        i = pl.program_id(0)
        nvalid = rows_total - i * tile_r
        row_ids = lax.broadcasted_iota(jnp.int32, y.shape, 0)
        y = jnp.where(row_ids < nvalid, y, 0.0)
    s = jnp.sum(y, axis=0, keepdims=True)
    ss = jnp.sum(y * y, axis=0, keepdims=True)
    stats_ref[0] = jnp.concatenate([s, ss], axis=0)


def _bn_relu_kernel(y_ref, scale_ref, shift_ref, out_ref):
    """BatchNorm affine (precomputed per-lane scale/shift) + ReLU, packed layout."""
    x = y_ref[...].astype(jnp.float32)
    out_ref[...] = jnp.maximum(x * scale_ref[...] + shift_ref[...], 0.0)


def _bn_relu_pool_kernel(y_ref, scale_ref, shift_ref, out_ref, *, ho, wo, c_pad):
    """Fused BN affine + ReLU + 3x3 / stride-2 / pad-1 max pool (H and W directions)
    on a block of TB (n,t) slabs.  Input block is the packed conv output
    [TB, Ho*Wo/pack, pack*c_pad]; output is lane-dense [TB, Ho2, Wo2*c_pad].
    Post-ReLU values are >= 0, so zero padding is equivalent to -inf padding."""
    tb = y_ref.shape[0]
    ho2 = (ho - 1) // 2 + 1
    wo2 = (wo - 1) // 2 + 1
    L = wo * c_pad

    x = y_ref[...].astype(jnp.float32)
    x = jnp.maximum(x * scale_ref[...] + shift_ref[...], 0.0)
    x = x.reshape(tb, ho, L)

    # ---- H direction (vectorized: even/odd row split + one shifted slice) ----
    if ho % 2 == 1:
        x = jnp.concatenate([x, jnp.zeros((tb, 1, L), x.dtype)], axis=1)
    v = x.reshape(tb, ho2, 2 * L)
    hc = v[:, :, :L]                         # rows 2j   (window center)
    hr = v[:, :, L:]                         # rows 2j+1 (window right)
    if ho2 > 1:
        hl = jnp.concatenate(                # rows 2j-1 (window left)
            [jnp.zeros((tb, 1, L), x.dtype), hr[:, :ho2 - 1, :]], axis=1)
    else:
        hl = jnp.zeros_like(hc)
    h = jnp.maximum(jnp.maximum(hc, hr), hl)  # [tb, ho2, Wo*c_pad]

    # ---- W direction ----
    if wo % 2 == 1:
        h = jnp.concatenate([h, jnp.zeros((tb, ho2, c_pad), h.dtype)], axis=2)
    u = h.reshape(tb, ho2, wo2, 2 * c_pad)
    wc = u[..., :c_pad]                       # cols 2j
    wr = u[..., c_pad:]                       # cols 2j+1
    if wo2 > 1:
        wl = jnp.concatenate(                 # cols 2j-1
            [jnp.zeros((tb, ho2, 1, c_pad), h.dtype), wr[:, :, :wo2 - 1, :]], axis=2)
    else:
        wl = jnp.zeros_like(wc)
    p = jnp.maximum(jnp.maximum(wc, wr), wl)  # [tb, ho2, wo2, c_pad]

    out_ref[...] = p.reshape(tb, ho2, wo2 * c_pad)


# ------------------------------ Module wrapper ------------------------------ #

class ResNeXt3DStemPallas:
    """Equivalent of classy_vision ResNeXt3DStem (single pathway) forward pass."""

    def __init__(self, temporal_kernel, spatial_kernel, input_planes, stem_planes,
                 maxpool, bn_eps=1e-5, conv_tile_rows=2048, key=None):
        self.kernel = (temporal_kernel, spatial_kernel, spatial_kernel)
        self.stride = (1, 2, 2)
        self.padding = (temporal_kernel // 2, spatial_kernel // 2, spatial_kernel // 2)
        self.maxpool = maxpool
        self.bn_eps = bn_eps
        self.dim_in = input_planes
        self.dim_out = stem_planes
        self.conv_tile_rows = conv_tile_rows

        key = jax.random.PRNGKey(0) if key is None else key
        kw_key, kg_key, kb_key = jax.random.split(key, 3)
        kt, kh, kw = self.kernel
        # Conv3d weight: [Cout, Cin, kt, kh, kw], bias=False.
        self.w = 0.1 * jax.random.normal(
            kw_key, (stem_planes, input_planes, kt, kh, kw), dtype=jnp.float32)
        # BatchNorm3d affine params: [Cout].
        self.gamma = 1.0 + 0.05 * jax.random.normal(kg_key, (stem_planes,), jnp.float32)
        self.beta = 0.05 * jax.random.normal(kb_key, (stem_planes,), jnp.float32)
        # TODO(synk): BatchNorm running_mean/var momentum updates are training-state
        # bookkeeping that do not affect the forward output and are not modeled.

        # ---- lane-packing geometry (pack output positions to fill 128 lanes) ----
        lane = 128
        if stem_planes <= lane:
            c_pad = 1
            while c_pad < stem_planes:
                c_pad *= 2
            pack_max = lane // c_pad
        else:
            c_pad = _round_up(stem_planes, lane)
            pack_max = 1
        self.c_pad = c_pad
        self.pack_max = pack_max

        self._jit_forward = jax.jit(self._forward)

    # -- forward (traced under jit; shapes are static) -------------------------
    def _forward(self, x):
        N, Cin, T, H, W = x.shape
        assert Cin == self.dim_in
        Cout = self.dim_out
        kt, kh, kw = self.kernel
        st, sh, sw = self.stride
        pt, ph, pw = self.padding
        c_pad = self.c_pad

        To = (T + 2 * pt - kt) // st + 1
        Ho = (H + 2 * ph - kh) // sh + 1
        Wo = (W + 2 * pw - kw) // sw + 1
        NT = N * To
        M = NT * Ho * Wo
        K = kt * kh * kw * Cin

        # Effective pack: largest power of two <= pack_max dividing Ho*Wo so that
        # packed rows never straddle a (n, t) slab boundary.
        pack = self.pack_max
        while pack > 1 and (Ho * Wo) % pack != 0:
            pack //= 2
        nl = pack * c_pad
        HWp = (Ho * Wo) // pack
        R = M // pack

        # ---- block-diagonal im2col weight matrix (compile-time constant) ----
        w_mat = jnp.transpose(self.w, (2, 3, 4, 1, 0)).reshape(K, Cout)
        w_pad = jnp.zeros((K, c_pad), jnp.float32).at[:, :Cout].set(w_mat)
        w_blk = jnp.kron(jnp.eye(pack, dtype=jnp.float32), w_pad) if pack > 1 else w_pad
        w_blk = w_blk.astype(jnp.bfloat16)                     # [pack*K, nl]

        # ---- im2col patches (bf16, single concat materialization, no K padding) ----
        # TODO(synk): build the packed patches inside the conv kernel with strided
        # DMA from the padded NDHWC input (memory_space=pl.ANY) to remove this
        # remaining HBM round-trip.
        xcl = jnp.transpose(x, (0, 2, 3, 4, 1)).astype(jnp.bfloat16)   # NDHWC bf16
        xp = jnp.pad(xcl, ((0, 0), (pt, pt), (ph, ph), (pw, pw), (0, 0)))
        taps = []
        for dt in range(kt):
            for dh in range(kh):
                for dw in range(kw):
                    taps.append(
                        xp[:,
                           dt:dt + st * (To - 1) + 1:st,
                           dh:dh + sh * (Ho - 1) + 1:sh,
                           dw:dw + sw * (Wo - 1) + 1:sw,
                           :])                                  # [N,To,Ho,Wo,Cin]
        patches = jnp.concatenate(taps, axis=-1)                # [N,To,Ho,Wo,K] bf16
        patches_packed = patches.reshape(R, pack * K)           # lane-packed rows

        # ---- conv tile size: large tiles, capped by VMEM budget, >=2 grid steps ----
        tile_r = max(16, min(_round_up(self.conv_tile_rows, 16), _round_up(R, 16)))
        row_bytes = (pack * K + nl) * 2
        cap = max(16, (_CONV_VMEM_BUDGET // max(row_bytes, 1)) // 16 * 16)
        tile_r = min(tile_r, cap)
        n_tiles = _cdiv(R, tile_r)
        if n_tiles == 1 and R > 16:
            tile_r = max(16, _round_up(_cdiv(R, 2), 16))        # keep both v7x TCs busy
            n_tiles = _cdiv(R, tile_r)

        cparams = pltpu.CompilerParams(dimension_semantics=("parallel",),
                                       vmem_limit_bytes=_VMEM_LIMIT_BYTES)

        # ---- kernel 1: tiled conv matmul (bf16 out) + per-tile BN partial sums ----
        y_conv, stats = pl.pallas_call(
            functools.partial(_conv_stats_kernel, rows_total=R, tile_r=tile_r),
            grid=(n_tiles,),
            in_specs=[
                pl.BlockSpec((tile_r, pack * K), lambda i: (i, 0)),
                pl.BlockSpec((pack * K, nl), lambda i: (0, 0)),
            ],
            out_specs=[
                pl.BlockSpec((tile_r, nl), lambda i: (i, 0)),
                pl.BlockSpec((1, 2, nl), lambda i: (i, 0, 0)),
            ],
            out_shape=[
                jax.ShapeDtypeStruct((R, nl), jnp.bfloat16),
                jax.ShapeDtypeStruct((n_tiles, 2, nl), jnp.float32),
            ],
            compiler_params=cparams,
        )(patches_packed, w_blk)

        # ---- BatchNorm batch statistics (training mode, biased variance) ----
        # Note: single-pass E[x^2]-E[x]^2 in f32; fine for this regime (stem conv
        # outputs are near zero mean), documented as a known limitation.
        tot = jnp.sum(stats, axis=0).reshape(2, pack, c_pad).sum(axis=1)   # [2, c_pad]
        ch_sum = tot[0, :Cout]
        ch_ssq = tot[1, :Cout]
        mean = ch_sum / M
        var = jnp.maximum(ch_ssq / M - mean * mean, 0.0)
        inv_std = lax.rsqrt(var + self.bn_eps)
        scale_c = self.gamma * inv_std
        shift_c = self.beta - mean * scale_c
        scale_lane = jnp.zeros((c_pad,), jnp.float32).at[:Cout].set(scale_c)
        shift_lane = jnp.zeros((c_pad,), jnp.float32).at[:Cout].set(shift_c)
        scale_l = jnp.tile(scale_lane, pack).reshape(1, nl)
        shift_l = jnp.tile(shift_lane, pack).reshape(1, nl)

        # Packed conv output viewed per (n, t) slab -- no slice copy, exact rows.
        y3 = y_conv.reshape(NT, HWp, nl)

        # ---- slab batching for the BN/ReLU/pool pass ----
        slab_bytes = HWp * nl * 2
        TB = max(1, min(NT, _POOL_BLOCK_BYTES // max(slab_bytes, 1)))
        if NT >= 2:
            TB = max(1, min(TB, NT // 2))   # >=2 grid steps for v7x's two TensorCores
        nt_blocks = _cdiv(NT, TB)

        if not self.maxpool:
            act = pl.pallas_call(
                _bn_relu_kernel,
                grid=(nt_blocks,),
                in_specs=[
                    pl.BlockSpec((TB, HWp, nl), lambda i: (i, 0, 0)),
                    pl.BlockSpec((1, nl), lambda i: (0, 0)),
                    pl.BlockSpec((1, nl), lambda i: (0, 0)),
                ],
                out_specs=pl.BlockSpec((TB, HWp, nl), lambda i: (i, 0, 0)),
                out_shape=jax.ShapeDtypeStruct((NT, HWp, nl), jnp.float32),
                compiler_params=cparams,
            )(y3, scale_l, shift_l)
            y5 = act.reshape(N, To, Ho, Wo, c_pad)
            if c_pad != Cout:
                y5 = y5[..., :Cout]
            return jnp.transpose(y5, (0, 4, 1, 2, 3))           # NCDHW

        Ho2 = (Ho - 1) // 2 + 1     # MaxPool3d([1,3,3], stride [1,2,2], pad [0,1,1])
        Wo2 = (Wo - 1) // 2 + 1

        pooled = pl.pallas_call(
            functools.partial(_bn_relu_pool_kernel, ho=Ho, wo=Wo, c_pad=c_pad),
            grid=(nt_blocks,),
            in_specs=[
                pl.BlockSpec((TB, HWp, nl), lambda i: (i, 0, 0)),
                pl.BlockSpec((1, nl), lambda i: (0, 0)),
                pl.BlockSpec((1, nl), lambda i: (0, 0)),
            ],
            out_specs=pl.BlockSpec((TB, Ho2, Wo2 * c_pad), lambda i: (i, 0, 0)),
            out_shape=jax.ShapeDtypeStruct((NT, Ho2, Wo2 * c_pad), jnp.float32),
            compiler_params=cparams,
        )(y3, scale_l, shift_l)

        y5 = pooled.reshape(N, To, Ho2, Wo2, c_pad)
        if c_pad != Cout:
            y5 = y5[..., :Cout]
        return jnp.transpose(y5, (0, 4, 1, 2, 3))               # NCDHW

    def __call__(self, x):
        """x: [N, Cin, T, H, W] float32 (PyTorch NCDHW). Returns NCDHW output."""
        return self._jit_forward(x)


# ------------------------------ pure-JAX reference -------------------------- #

def reference_forward(x, w, gamma, beta, eps, stride, padding, maxpool):
    y = lax.conv_general_dilated(
        x, w, window_strides=stride, padding=[(p, p) for p in padding],
        dimension_numbers=("NCDHW", "OIDHW", "NCDHW"))
    mean = jnp.mean(y, axis=(0, 2, 3, 4), keepdims=True)
    var = jnp.mean((y - mean) ** 2, axis=(0, 2, 3, 4), keepdims=True)
    y = (y - mean) * lax.rsqrt(var + eps)
    y = jnp.maximum(y * gamma.reshape(1, -1, 1, 1, 1) + beta.reshape(1, -1, 1, 1, 1), 0.0)
    if maxpool:
        y = lax.reduce_window(y, -jnp.inf, lax.max,
                              window_dimensions=(1, 1, 1, 3, 3),
                              window_strides=(1, 1, 1, 2, 2),
                              padding=((0, 0), (0, 0), (0, 0), (1, 1), (1, 1)))
    return y


# ----------------------------------- main ----------------------------------- #

if __name__ == "__main__":
    # ResNeXt3DStem(temporal_kernel=3, spatial_kernel=3, input_planes=3,
    #               stem_planes=32, maxpool=True)
    temporal_kernel, spatial_kernel = 3, 3
    input_planes, stem_planes = 3, 32

    # PyTorch-style NCDHW input: [N, C, T, H, W]
    x = jax.random.normal(jax.random.PRNGKey(1), (2, 3, 4, 16, 16), dtype=jnp.float32)

    # maxpool=True path
    model = ResNeXt3DStemPallas(temporal_kernel, spatial_kernel, input_planes,
                                stem_planes, maxpool=True, key=jax.random.PRNGKey(0))
    out = jax.block_until_ready(model(x))
    assert out.shape == (2, 32, 4, 4, 4), f"unexpected output shape {out.shape}"

    ref = reference_forward(x, model.w, model.gamma, model.beta, model.bn_eps,
                            model.stride, model.padding, maxpool=True)
    ref = jax.block_until_ready(ref)
    max_err = float(jnp.max(jnp.abs(out - ref)))
    if not jnp.allclose(out, ref, atol=5e-2, rtol=5e-2):
        raise AssertionError(f"maxpool path mismatch vs reference, max abs err = {max_err}")

    # maxpool=False path
    model_np = ResNeXt3DStemPallas(temporal_kernel, spatial_kernel, input_planes,
                                   stem_planes, maxpool=False, key=jax.random.PRNGKey(0))
    out_np = jax.block_until_ready(model_np(x))
    assert out_np.shape == (2, 32, 4, 8, 8), f"unexpected output shape {out_np.shape}"
    ref_np = reference_forward(x, model_np.w, model_np.gamma, model_np.beta,
                               model_np.bn_eps, model_np.stride, model_np.padding,
                               maxpool=False)
    ref_np = jax.block_until_ready(ref_np)
    max_err_np = float(jnp.max(jnp.abs(out_np - ref_np)))
    if not jnp.allclose(out_np, ref_np, atol=5e-2, rtol=5e-2):
        raise AssertionError(
            f"no-maxpool path mismatch vs reference, max abs err = {max_err_np}")

    print("KERNEL_OK")
</pallas_src>

<mosaic_0001>
module attributes {stable_mosaic.version = 11 : i64} {
  func.func @_conv_stats_kernel(%arg0: i32, %arg1: memref<64x324xbf16, #tpu.memory_space<vmem>>, %arg2: memref<324x128xbf16, #tpu.memory_space<vmem>>, %arg3: memref<64x128xbf16, #tpu.memory_space<vmem>>, %arg4: memref<1x2x128xf32, #tpu.memory_space<vmem>>) attributes {dimension_semantics = [#tpu.dimension_semantics<parallel>], iteration_bounds = array<i64: 2>, scalar_prefetch = 0 : i64, scratch_operands = 0 : i64, tpu.core_type = #tpu.core_type<tc>, window_params = [{transform_indices = @transform_0, window_bounds = array<i64: 64, 324>}, {pipeline_mode = #tpu.pipeline_mode<synchronous>, transform_indices = @transform_1, window_bounds = array<i64: 324, 128>}, {transform_indices = @transform_2, window_bounds = array<i64: 64, 128>}, {transform_indices = @transform_3, window_bounds = array<i64: 1, 2, 128>}]} {
    %c0 = arith.constant 0 : index
    %c0_0 = arith.constant 0 : index
    %0 = vector.load %arg1[%c0, %c0_0] : memref<64x324xbf16, #tpu.memory_space<vmem>>, vector<64x324xbf16>
    %c0_1 = arith.constant 0 : index
    %c0_2 = arith.constant 0 : index
    %1 = vector.load %arg2[%c0_1, %c0_2] : memref<324x128xbf16, #tpu.memory_space<vmem>>, vector<324x128xbf16>
    %cst = arith.constant dense<0.000000e+00> : vector<64x128xf32>
    %2 = tpu.matmul %0, %1, %cst {dimension_numbers = #tpu.dot_dimension_numbers<[1], [0], [0], [1], [0, 0, 1, 1], [], []>} : vector<64x324xbf16>, vector<324x128xbf16>, vector<64x128xf32> -> vector<64x128xf32>
    %3 = arith.truncf %2 : vector<64x128xf32> to vector<64x128xbf16>
    %c0_3 = arith.constant 0 : index
    %c0_4 = arith.constant 0 : index
    %4 = vector.load %arg3[%c0_3, %c0_4] : memref<64x128xbf16, #tpu.memory_space<vmem>>, vector<64x128xbf16>
    tpu.vector_store %arg3[%c0_3, %c0_4], %3 {strides = array<i32>} : memref<64x128xbf16, #tpu.memory_space<vmem>>, vector<64x128xbf16>,
    %cst_5 = arith.constant dense<0.000000e+00> : vector<128xf32>
    %5 = vector.multi_reduction <add>, %2, %cst_5 [0] : vector<64x128xf32> to vector<128xf32>
    %6 = vector.shape_cast %5 : vector<128xf32> to vector<1x128xf32>
    %7 = arith.mulf %2, %2 : vector<64x128xf32>
    %cst_6 = arith.constant dense<0.000000e+00> : vector<128xf32>
    %8 = vector.multi_reduction <add>, %7, %cst_6 [0] : vector<64x128xf32> to vector<128xf32>
    %9 = vector.shape_cast %8 : vector<128xf32> to vector<1x128xf32>
    %10 = tpu.concatenate %6, %9 in 0 : vector<1x128xf32>, vector<1x128xf32> -> vector<2x128xf32>
    %c0_7 = arith.constant 0 : index
    %c0_8 = arith.constant 0 : index
    %c0_9 = arith.constant 0 : index
    %11 = vector.load %arg4[%c0_7, %c0_8, %c0_9] : memref<1x2x128xf32, #tpu.memory_space<vmem>>, vector<1x2x128xf32>
    %12 = vector.shape_cast %11 : vector<1x2x128xf32> to vector<2x128xf32>
    %13 = vector.shape_cast %10 : vector<2x128xf32> to vector<1x2x128xf32>
    tpu.vector_store %arg4[%c0_7, %c0_8, %c0_9], %13 {strides = array<i32>} : memref<1x2x128xf32, #tpu.memory_space<vmem>>, vector<1x2x128xf32>,
    return
  }
  func.func @transform_0(%arg0: i32) -> (i32, i32) {
    %c0_i32 = arith.constant 0 : i32
    %c0_i32_0 = arith.constant 0 : i32
    return %arg0, %c0_i32 : i32, i32
  }
  func.func @transform_1(%arg0: i32) -> (i32, i32) {
    %c0_i32 = arith.constant 0 : i32
    %c0_i32_0 = arith.constant 0 : i32
    %c0_i32_1 = arith.constant 0 : i32
    return %c0_i32, %c0_i32_0 : i32, i32
  }
  func.func @transform_2(%arg0: i32) -> (i32, i32) {
    %c0_i32 = arith.constant 0 : i32
    %c0_i32_0 = arith.constant 0 : i32
    return %arg0, %c0_i32 : i32, i32
  }
  func.func @transform_3(%arg0: i32) -> (i32, i32, i32) {
    %c0_i32 = arith.constant 0 : i32
    %c0_i32_0 = arith.constant 0 : i32
    %c0_i32_1 = arith.constant 0 : i32
    return %arg0, %c0_i32, %c0_i32_0 : i32, i32, i32
  }
}

module attributes {stable_mosaic.version = 11 : i64} {
  func.func @_bn_relu_pool_kernel(%arg0: i32, %arg1: memref<4x16x128xbf16, #tpu.memory_space<vmem>>, %arg2: memref<1x128xf32, #tpu.memory_space<vmem>>, %arg3: memref<1x128xf32, #tpu.memory_space<vmem>>, %arg4: memref<4x4x128xf32, #tpu.memory_space<vmem>>) attributes {dimension_semantics = [#tpu.dimension_semantics<parallel>], iteration_bounds = array<i64: 2>, scalar_prefetch = 0 : i64, scratch_operands = 0 : i64, tpu.core_type = #tpu.core_type<tc>, window_params = [{transform_indices = @transform_0, window_bounds = array<i64: 4, 16, 128>}, {pipeline_mode = #tpu.pipeline_mode<synchronous>, transform_indices = @transform_1, window_bounds = array<i64: 1, 128>}, {pipeline_mode = #tpu.pipeline_mode<synchronous>, transform_indices = @transform_2, window_bounds = array<i64: 1, 128>}, {transform_indices = @transform_3, window_bounds = array<i64: 4, 4, 128>}]} {
    %c0 = arith.constant 0 : index
    %c0_0 = arith.constant 0 : index
    %c0_1 = arith.constant 0 : index
    %0 = vector.load %arg1[%c0, %c0_0, %c0_1] : memref<4x16x128xbf16, #tpu.memory_space<vmem>>, vector<4x16x128xbf16>
    %1 = arith.extf %0 : vector<4x16x128xbf16> to vector<4x16x128xf32>
    %c0_2 = arith.constant 0 : index
    %c0_3 = arith.constant 0 : index
    %2 = vector.load %arg2[%c0_2, %c0_3] : memref<1x128xf32, #tpu.memory_space<vmem>>, vector<1x128xf32>
    %3 = vector.shape_cast %2 : vector<1x128xf32> to vector<1x1x128xf32>
    %4 = vector.broadcast %3 : vector<1x1x128xf32> to vector<4x16x128xf32>
    %5 = arith.mulf %1, %4 : vector<4x16x128xf32>
    %c0_4 = arith.constant 0 : index
    %c0_5 = arith.constant 0 : index
    %6 = vector.load %arg3[%c0_4, %c0_5] : memref<1x128xf32, #tpu.memory_space<vmem>>, vector<1x128xf32>
    %7 = vector.shape_cast %6 : vector<1x128xf32> to vector<1x1x128xf32>
    %8 = vector.broadcast %7 : vector<1x1x128xf32> to vector<4x16x128xf32>
    %9 = arith.addf %5, %8 : vector<4x16x128xf32>
    %cst = arith.constant 0.000000e+00 : f32
    %10 = vector.broadcast %cst : f32 to vector<4x16x128xf32>
    %11 = arith.maximumf %9, %10 : vector<4x16x128xf32>
    %12 = vector.shape_cast %11 : vector<4x16x128xf32> to vector<4x8x256xf32>
    %13 = vector.shape_cast %12 : vector<4x8x256xf32> to vector<4x4x512xf32>
    %14 = vector.extract_strided_slice %13 {offsets = [0, 0, 0], sizes = [4, 4, 256], strides = [1, 1, 1]} : vector<4x4x512xf32> to vector<4x4x256xf32>
    %15 = vector.extract_strided_slice %13 {offsets = [0, 0, 256], sizes = [4, 4, 256], strides = [1, 1, 1]} : vector<4x4x512xf32> to vector<4x4x256xf32>
    %cst_6 = arith.constant 0.000000e+00 : f32
    %16 = vector.broadcast %cst_6 : f32 to vector<4x1x256xf32>
    %17 = vector.extract_strided_slice %15 {offsets = [0, 0, 0], sizes = [4, 3, 256], strides = [1, 1, 1]} : vector<4x4x256xf32> to vector<4x3x256xf32>
    %18 = tpu.concatenate %16, %17 in 1 : vector<4x1x256xf32>, vector<4x3x256xf32> -> vector<4x4x256xf32>
    %19 = arith.maximumf %14, %15 : vector<4x4x256xf32>
    %20 = arith.maximumf %19, %18 : vector<4x4x256xf32>
    %21 = vector.shape_cast %20 : vector<4x4x256xf32> to vector<4x4x4x64xf32>
    %22 = vector.extract_strided_slice %21 {offsets = [0, 0, 0, 0], sizes = [4, 4, 4, 32], strides = [1, 1, 1, 1]} : vector<4x4x4x64xf32> to vector<4x4x4x32xf32>
    %23 = vector.extract_strided_slice %21 {offsets = [0, 0, 0, 32], sizes = [4, 4, 4, 32], strides = [1, 1, 1, 1]} : vector<4x4x4x64xf32> to vector<4x4x4x32xf32>
    %cst_7 = arith.constant 0.000000e+00 : f32
    %24 = vector.broadcast %cst_7 : f32 to vector<4x4x1x32xf32>
    %25 = vector.extract_strided_slice %23 {offsets = [0, 0, 0, 0], sizes = [4, 4, 3, 32], strides = [1, 1, 1, 1]} : vector<4x4x4x32xf32> to vector<4x4x3x32xf32>
    %26 = tpu.concatenate %24, %25 in 2 : vector<4x4x1x32xf32>, vector<4x4x3x32xf32> -> vector<4x4x4x32xf32>
    %27 = arith.maximumf %22, %23 : vector<4x4x4x32xf32>
    %28 = arith.maximumf %27, %26 : vector<4x4x4x32xf32>
    %29 = vector.shape_cast %28 : vector<4x4x4x32xf32> to vector<4x4x128xf32>
    %c0_8 = arith.constant 0 : index
    %c0_9 = arith.constant 0 : index
    %c0_10 = arith.constant 0 : index
    %30 = vector.load %arg4[%c0_8, %c0_9, %c0_10] : memref<4x4x128xf32, #tpu.memory_space<vmem>>, vector<4x4x128xf32>
    tpu.vector_store %arg4[%c0_8, %c0_9, %c0_10], %29 {strides = array<i32>} : memref<4x4x128xf32, #tpu.memory_space<vmem>>, vector<4x4x128xf32>,
    return
  }
  func.func @transform_0(%arg0: i32) -> (i32, i32, i32) {
    %c0_i32 = arith.constant 0 : i32
    %c0_i32_0 = arith.constant 0 : i32
    %c0_i32_1 = arith.constant 0 : i32
    return %arg0, %c0_i32, %c0_i32_0 : i32, i32, i32
  }
  func.func @transform_1(%arg0: i32) -> (i32, i32) {
    %c0_i32 = arith.constant 0 : i32
    %c0_i32_0 = arith.constant 0 : i32
    %c0_i32_1 = arith.constant 0 : i32
    return %c0_i32, %c0_i32_0 : i32, i32
  }
  func.func @transform_2(%arg0: i32) -> (i32, i32) {
    %c0_i32 = arith.constant 0 : i32
    %c0_i32_0 = arith.constant 0 : i32
    %c0_i32_1 = arith.constant 0 : i32
    return %c0_i32, %c0_i32_0 : i32, i32
  }
  func.func @transform_3(%arg0: i32) -> (i32, i32, i32) {
    %c0_i32 = arith.constant 0 : i32
    %c0_i32_0 = arith.constant 0 : i32
    %c0_i32_1 = arith.constant 0 : i32
    return %arg0, %c0_i32, %c0_i32_0 : i32, i32, i32
  }
}

</mosaic_0001>

<bundles_post_ra>
// kernel: tile.18
= control target key start
LH: loop header
LB: loop body
LE: loop exit
PB: predicated region body
PF: predicated region fallthrough
CT: control target
= control target key end

     0   :  { %s22_s0 = inlined_call_operand.vmem [shape: f32[32], index: 0, kind: input, shape index: {}]   ;;  %s23_s1 = inlined_call_operand.vmem [shape: f32[4,32], index: 1, kind: output, shape index: {}]  }
   0x1   :  { %v4_v0 = vld [vmem:[%s22_s0] ss:$0 sm:$0xff] }
   0x2   :  { %5 = vst [vmem:[%s23_s1] sm:$0xf] %v4_v0 }

// kernel: tile.19
= control target key start
LH: loop header
LB: loop body
LE: loop exit
PB: predicated region body
PF: predicated region fallthrough
CT: control target
= control target key end

     0   :  { %s37_s8 = smov 32   ;;  %s38_s9 = smov 64   ;;  %vm7_vm0 = vcmask 261120   ;;  %vm13_vm1 = vcmask 1048320   ;;  %vm19_vm2 = vcmask 785920   ;;  %vm25_vm3 = vcmask 523520   ;;  %s55_s0 = inlined_call_operand.vmem [shape: f32[4,32], index: 0, kind: input, shape index: {}]   ;;  %s56_s1 = inlined_call_operand.vmem [shape: f32[1,128], index: 1, kind: output, shape index: {}]  }
   0x1   :  { %v4_v0 = vld [vmem:[%s55_s0] sm:$0xf]  ;;  %s36_s0 = smov 96  }
   0x2   :  { %5 = vst [vmem:[#allocation1] sm:$0xf] %v4_v0 }
   0x9   :  { %v10_v1 = vld [vmem:[#allocation1 + $0x3] sm:$0x1]   ;;  %v22_v2 = vld [vmem:[#allocation1 + $0x1] sm:$0x1]   ;;  %v16_v3 = vld [vmem:[#allocation1 + $0x2] sm:$0x1]  }
   0xa   :  { %11 = vrot.lane.b32.xlu0 %v10_v1, %s36_s0  ;;  %23 = vrot.lane.b32.xlu1 %v22_v2, %s37_s8  ;;  %v6_v4 = vld [vmem:[#allocation1] sm:$0x1]  }
   0xb   :  { %8 = vst.msk [vmem:[#allocation0] sm:$0x1] %vm7_vm0, %v6_v4  }
  0x12   :  { %17 = vrot.lane.b32.xlu0 %v16_v3, %s38_s9 }
  0x7c   :  { %v12_v5 = vpop.permute.xlu0 %11   ;;  %v24_v6 = vpop.permute.xlu1 %23  }
  0x7d   :  { %14 = vst.msk [vmem:[#allocation0] sm:$0x1] %vm13_vm1, %v12_v5  }
  0x84   :  { %v18_v7 = vpop.permute.xlu0 %17  }
  0x85   :  { %20 = vst.msk [vmem:[#allocation0] sm:$0x1] %vm19_vm2, %v18_v7  }
  0x86   :  { %26 = vst.msk [vmem:[#allocation0] sm:$0x1] %vm25_vm3, %v24_v6  }
  0x8d   :  { %v29_v8 = vld [vmem:[#allocation0] sm:$0x1] }
  0x8e   :  { %32 = vst [vmem:[%s56_s1] sm:$0x1] %v29_v8 }

// kernel: _forward.2
= control target key start
LH: loop header
LB: loop body
LE: loop exit
PB: predicated region body
PF: predicated region fallthrough
CT: control target
= control target key end

     0   :  { %s917_s12 = smov 0   ;;  %s1045_s0 = inlined_call_operand.vmem [shape: bf16[128,324], index: 0, kind: input, shape index: {}]   ;;  %s1046_s1 = inlined_call_operand.vmem [shape: bf16[324,128], index: 1, kind: input, shape index: {}]   ;;  %s1047_s2 = inlined_call_operand.vmem [shape: bf16[128,128], index: 2, kind: output, shape index: {0}]   ;;  %s1048_s3 = inlined_call_operand.vmem [shape: f32[2,2,128], index: 3, kind: output, shape index: {1}]  }
   0x1 LB: > { %s923_s13 = sadd.s32 4294967295, %s895_s12   ;;  %p677_p0 = scmp.ge.s32.totalorder %s895_s12, 1  ;;  %s895_s12 = sphi %s917_s12, %s14_s12  }
   0x2   : > { %p142_p1 = scmp.lt.s32.totalorder %s895_s12, 3 }
   0x4   : > { %p143_p2 = pnand %p677_p0, %p142_p1 }
   0x5   : > { %s678_s20 = sshll.u32 (!%p143_p2), %s923_s13, 3  ;;  %p184_p4 = scmp.lt.s32.totalorder (!%p143_p2), %s923_s13, 1 }
   0x6   : > { %146 = sbr.rel (%p143_p2) target bundleno = 248 (0xf8), region = 28  ;;  %p172_p3 = scmp.lt.s32.totalorder (!%p143_p2), %s678_s20, 15 }
   0xb   : > { %v836_v0 = vld [vmem:[%s1046_s1 + $0x38] sm:$0xff]  ;;  %v245_v2 = vld [vmem:[%s1046_s1 + $0xa0] sm:$0x3]  ;;  %vm442_vm0 = vcmask 1041408   ;;  %v835_v4 = vld [vmem:[%s1046_s1 + $0x30] sm:$0xff]  ;;  %s1050_s20 = smov (!%p172_p3, %s678_s20), 15 }
   0xc   : > { %v844_v1 = vld [vmem:[%s1046_s1 + $0x78] sm:$0xff]  ;;  %v387_v3 = vunpack.c.l.b16 %v245_v2  ;;  %446 = vmatpush.bf16.msra.mxu0 %v836_v0  ;;  %872 = vmatpush.bf16.msra.mxu3 %v836_v0  ;;  %v843_v6 = vld [vmem:[%s1046_s1 + $0x70] sm:$0xff]  ;;  %v834_v9 = vld [vmem:[%s1046_s1 + $0x28] sm:$0xff]  ;;  %s880_s10 = smul.u32 12, %s1050_s20  ;;  %vm429_vm1 = vcmask 556032   ;;  %s1052_s13 = smov (!%p184_p4, %s923_s13), 1 }
   0xd   : > { %475 = vmatpush.bf16.msra.mxu1 %v844_v1  ;;  %v848_v8 = vld [vmem:[%s1046_s1 + $0x98] sm:$0xff]  ;;  %v842_v10 = vld [vmem:[%s1046_s1 + $0x68] sm:$0xff]  ;;  %v847_v11 = vld [vmem:[%s1046_s1 + $0x90] sm:$0xff]  ;;  %vm583_vm2 = vcmask 1040384  }
   0xe   : > { %v408_v5 = vpack.c.b16 %v387_v3, %v387_v3  ;;  %v833_v12 = vld [vmem:[%s1046_s1 + $0x20] sm:$0xff]  ;;  %v846_v14 = vld [vmem:[%s1046_s1 + $0x88] sm:$0xff]  ;;  %v832_v15 = vld [vmem:[%s1046_s1 + $0x18] sm:$0xff]  ;;  %s976_s22 = scalar_lea.vmem %s1045_s0, %s880_s10  ;;  %s681_s10 = sshll.u32 %s1050_s20, 2 }
   0xf   : > { %v841_v13 = vld [vmem:[%s1046_s1 + $0x60] sm:$0xff]  ;;  %v840_v16 = vld [vmem:[%s1046_s1 + $0x58] sm:$0xff]  ;;  %v831_v18 = vld [vmem:[%s1046_s1 + $0x10] sm:$0xff]  ;;  %s1031_s15 = scalar_lea.vmem %s1047_s2, %s681_s10  ;;  %s682_s20 = sshll.u32 %s1052_s13, 1 }
  0x10   : > { %v444_v7 = vsel %vm442_vm0, %v408_v5, 0  ;;  %447 = vmatpush.bf16.msra.mxu0 %v835_v4  ;;  %873 = vmatpush.bf16.msra.mxu3 %v835_v4  ;;  %v845_v17 = vld [vmem:[%s1046_s1 + $0x80] sm:$0xff]  ;;  %v693_v19 = vld [vmem:[%s976_s22 + $0x8] sm:$0xf]  ;;  %v819_v20 = vld [vmem:[%s976_s22 + $0x10] sm:$0xf0]  ;;  %s187_s18 = scalar_lea.vmem %s1048_s3, %s682_s20 }
  0x11   : > { %507 = vmatpush.bf16.msra.mxu2 %v444_v7  ;;  %476 = vmatpush.bf16.msra.mxu1 %v843_v6  ;;  %v839_v21 = vld [vmem:[%s1046_s1 + $0x50] sm:$0xff]  ;;  %v694_v22 = vor.u32 %v819_v20, %v693_v19  ;;  %v830_v23 = vld [vmem:[%s1046_s1 + $0x8] sm:$0xff]  ;;  %v829_v25 = vld [vmem:[%s1046_s1] sm:$0xff] }
  0x12   : > { %v838_v24 = vld [vmem:[%s1046_s1 + $0x48] sm:$0xff]  ;;  %v837_v26 = vld [vmem:[%s1046_s1 + $0x40] sm:$0xff]  ;;  %v687_v30 = vld [vmem:[%s976_s22 + $0xc] sm:$0xf0] }
  0x13   : > { %v685_v27 = vld [vmem:[%s976_s22] sm:$0xf]  ;;  %v818_v28 = vld [vmem:[%s976_s22 + $0x8] sm:$0xf0]  ;;  %v817_v29 = vld [vmem:[%s976_s22 + $0x4] sm:$0xf] }
  0x14   : > { %448 = vmatpush.bf16.msra.mxu0 %v834_v9  ;;  %874 = vmatpush.bf16.msra.mxu3 %v834_v9  ;;  %v697_v31 = vld [vmem:[%s976_s22 + $0x18] sm:$0xf]  ;;  %v821_v32 = vld [vmem:[%s976_s22 + $0x20] sm:$0xf0]  ;;  %v686_v33 = vor.u32 %v818_v28, %v685_v27  ;;  %v690_v34 = vor.u32 %v817_v29, %v687_v30  ;;  %v705_v36 = vld [vmem:[%s976_s22 + $0x20] sm:$0xf] }
  0x15   : > { %508 = vmatpush.bf16.msra.mxu2 %v848_v8  ;;  %477 = vmatpush.bf16.msra.mxu1 %v842_v10  ;;  %v698_v35 = vor.u32 %v821_v32, %v697_v31  ;;  %v822_v37 = vld [vmem:[%s976_s22 + $0x28] sm:$0xf0]  ;;  %v820_v39 = vld [vmem:[%s976_s22 + $0x1c] sm:$0xf]  ;;  %v699_v40 = vld [vmem:[%s976_s22 + $0x24] sm:$0xf0] }
  0x16   : > { %v706_v38 = vor.u32 %v822_v37, %v705_v36  ;;  %v709_v41 = vld [vmem:[%s976_s22 + $0x30] sm:$0xf]  ;;  %v824_v42 = vld [vmem:[%s976_s22 + $0x38] sm:$0xf0]  ;;  %v702_v43 = vor.u32 %v820_v39, %v699_v40  ;;  %v717_v45 = vld [vmem:[%s976_s22 + $0x38] sm:$0xf] }
  0x17   : > { %v710_v44 = vor.u32 %v824_v42, %v709_v41  ;;  %v825_v46 = vld [vmem:[%s976_s22 + $0x40] sm:$0xf0]  ;;  %v823_v48 = vld [vmem:[%s976_s22 + $0x34] sm:$0xf]  ;;  %v711_v49 = vld [vmem:[%s976_s22 + $0x3c] sm:$0xf0] }
  0x18   : > { %449 = vmatpush.bf16.msra.mxu0 %v833_v12  ;;  %875 = vmatpush.bf16.msra.mxu3 %v833_v12  ;;  %v718_v47 = vor.u32 %v825_v46, %v717_v45  ;;  %v721_v50 = vld [vmem:[%s976_s22 + $0x48] sm:$0xf]  ;;  %v827_v51 = vld [vmem:[%s976_s22 + $0x50] sm:$0xf0]  ;;  %v714_v52 = vor.u32 %v823_v48, %v711_v49  ;;  %v729_v54 = vld [vmem:[%s976_s22 + $0x50] sm:$0xf] }
  0x19   : > { %509 = vmatpush.bf16.msra.mxu2 %v847_v11  ;;  %478 = vmatpush.bf16.msra.mxu1 %v841_v13  ;;  %v722_v53 = vor.u32 %v827_v51, %v721_v50  ;;  %v828_v55 = vld [vmem:[%s976_s22 + $0x58] sm:$0xf0]  ;;  %v826_v57 = vld [vmem:[%s976_s22 + $0x4c] sm:$0xf]  ;;  %v723_v58 = vld [vmem:[%s976_s22 + $0x54] sm:$0xf0] }
  0x1a   : > { %v730_v56 = vor.u32 %v828_v55, %v729_v54  ;;  %v726_v59 = vor.u32 %v826_v57, %v723_v58 }
  0x1c   : > { %450 = vmatpush.bf16.msra.mxu0 %v832_v15  ;;  %876 = vmatpush.bf16.msra.mxu3 %v832_v15 }
  0x1d   : > { %510 = vmatpush.bf16.msra.mxu2 %v846_v14  ;;  %479 = vmatpush.bf16.msra.mxu1 %v840_v16 }
  0x20   : > { %451 = vmatpush.bf16.msra.mxu0 %v831_v18  ;;  %877 = vmatpush.bf16.msra.mxu3 %v831_v18 }
  0x21   : > { %511 = vmatpush.bf16.msra.mxu2 %v845_v17  ;;  %480 = vmatpush.bf16.msra.mxu1 %v839_v21 }
  0x24   : > { %811 = vmatmul.msk.bf16.vlgmr.msra.gmra.mxu2 %vm429_vm1, %v694_v22  ;;  %452 = vmatpush.bf16.msra.mxu0 %v830_v23 }
  0x25   : > { %481 = vmatpush.bf16.msra.mxu1 %v838_v24  ;;  %878 = vmatpush.bf16.msra.mxu3 %v830_v23 }
  0x28   : > { %453 = vmatpush.bf16.msra.mxu0 %v829_v25 }
  0x29   : > { %482 = vmatpush.bf16.msra.mxu1 %v837_v26  ;;  %879 = vmatpush.bf16.msra.mxu3 %v829_v25 }
  0x2b   : > { %454 = vmatmul.bf16.vlgmr.msra.gmra.mxu0 %v686_v33 }
  0x2c   : > { %483 = vmatmul.bf16.vlgmr.msra.gmra.mxu1 %v690_v34  ;;  %459 = vmatmul.bf16.vlgmr.msra.gmra.mxu3 %v698_v35 }
  0x34   : > { %812 = vmatmul.msk.bf16.gmra.mxu2 %vm429_vm1, %v706_v38 }
  0x3c   : > { %488 = vmatmul.bf16.gmra.mxu1 %v702_v43  ;;  %464 = vmatmul.bf16.gmra.mxu3 %v710_v44 }
  0x44   : > { %813 = vmatmul.msk.bf16.gmra.mxu2 %vm429_vm1, %v718_v47 }
  0x4c   : > { %493 = vmatmul.bf16.gmra.mxu1 %v714_v52  ;;  %469 = vmatmul.bf16.gmra.mxu3 %v722_v53 }
  0x54   : > { %814 = vmatmul.msk.bf16.gmra.mxu2 %vm429_vm1, %v730_v56 }
  0x5c   : > { %498 = vmatmul.bf16.gmra.mxu1 %v726_v59 }
  0xa7   : > { %v513_v60 = vpop.f32.mrf.mxu2 }
  0xa8   : > { %v455_v61 = vpop.f32.mrf.mxu0 }
  0xa9   : > { %v484_v62 = vpop.f32.mrf.mxu1 }
  0xaa   : > { %v485_v1 = vadd.f32 %v484_v62, %v455_v61 }
  0xac   : > { %v514_v5 = vadd.f32 %v513_v60, %v485_v1 }
  0xae   : > { %v562_v33 = vmul.f32 %v514_v5, %v514_v5 }
  0xaf   : > { %v515_v63 = vpop.f32.mrf.mxu2  ;;  %v460_v0 = vpop.f32.mrf.mxu3 }
  0xb0   : > { %v457_v2 = vpop.f32.mrf.mxu0 }
  0xb1   : > { %v486_v3 = vpop.f32.mrf.mxu1 }
  0xb2   : > { %v487_v4 = vadd.f32 %v486_v3, %v457_v2 }
  0xb4   : > { %v516_v6 = vadd.f32 %v515_v63, %v487_v4 }
  0xb6   : > { %v852_v7 = vpack.c.bf16 %v516_v6, %v514_v5  ;;  %v563_v30 = vmul.f32 %v516_v6, %v516_v6  ;;  %v549_v34 = vadd.f32 %v516_v6, %v514_v5 }
  0xb7   : > { %v518_v8 = vpop.f32.mrf.mxu2  ;;  %v462_v9 = vpop.f32.mrf.mxu3 }
  0xb8   : > { %853 = vst [vmem:[%s1031_s15] sm:$0xff] %v852_v7   ;;  %v570_v37 = vadd.f32 %v563_v30, %v562_v33 }
  0xb9   : > { %v489_v10 = vpop.f32.mrf.mxu1 }
  0xba   : > { %v490_v12 = vadd.f32 %v489_v10, %v460_v0 }
  0xbc   : > { %v519_v16 = vadd.f32 %v518_v8, %v490_v12 }
  0xbe   : > { %v564_v35 = vmul.f32 %v519_v16, %v519_v16  ;;  %v550_v38 = vadd.f32 %v549_v34, %v519_v16 }
  0xbf   : > { %v520_v11 = vpop.f32.mrf.mxu2  ;;  %v465_v15 = vpop.f32.mrf.mxu3 }
  0xc0   : > { %v571_v40 = vadd.f32 %v570_v37, %v564_v35 }
  0xc1   : > { %v491_v13 = vpop.f32.mrf.mxu1 }
  0xc2   : > { %v492_v14 = vadd.f32 %v491_v13, %v462_v9 }
  0xc4   : > { %v521_v17 = vadd.f32 %v520_v11, %v492_v14 }
  0xc6   : > { %v857_v18 = vpack.c.bf16 %v521_v17, %v519_v16  ;;  %v565_v39 = vmul.f32 %v521_v17, %v521_v17  ;;  %v551_v41 = vadd.f32 %v550_v38, %v521_v17 }
  0xc7   : > { %v523_v19 = vpop.f32.mrf.mxu2  ;;  %v467_v21 = vpop.f32.mrf.mxu3 }
  0xc8   : > { %869 = vst [vmem:[%s1031_s15 + $0x8] sm:$0xff] %v857_v18   ;;  %v572_v44 = vadd.f32 %v571_v40, %v565_v39 }
  0xc9   : > { %v494_v20 = vpop.f32.mrf.mxu1 }
  0xca   : > { %v495_v23 = vadd.f32 %v494_v20, %v465_v15 }
  0xcc   : > { %v524_v26 = vadd.f32 %v523_v19, %v495_v23 }
  0xce   : > { %v566_v42 = vmul.f32 %v524_v26, %v524_v26  ;;  %v552_v45 = vadd.f32 %v551_v41, %v524_v26 }
  0xcf   : > { %v525_v22 = vpop.f32.mrf.mxu2  ;;  %v470_v29 = vpop.f32.mrf.mxu3 }
  0xd0   : > { %v573_v49 = vadd.f32 %v572_v44, %v566_v42 }
  0xd1   : > { %v496_v24 = vpop.f32.mrf.mxu1 }
  0xd2   : > { %v497_v25 = vadd.f32 %v496_v24, %v467_v21 }
  0xd4   : > { %v526_v27 = vadd.f32 %v525_v22, %v497_v25 }
  0xd6   : > { %v862_v28 = vpack.c.bf16 %v526_v27, %v524_v26  ;;  %v567_v46 = vmul.f32 %v526_v27, %v526_v27  ;;  %v553_v50 = vadd.f32 %v552_v45, %v526_v27 }
  0xd7   : > { %v528_v31 = vpop.f32.mrf.mxu2  ;;  %v472_v47 = vpop.f32.mrf.mxu3 }
  0xd8   : > { %870 = vst [vmem:[%s1031_s15 + $0x10] sm:$0xff] %v862_v28   ;;  %v574_v54 = vadd.f32 %v573_v49, %v567_v46 }
  0xd9   : > { %v499_v32 = vpop.f32.mrf.mxu1 }
  0xda   : > { %v500_v36 = vadd.f32 %v499_v32, %v470_v29 }
  0xdc   : > { %v529_v43 = vadd.f32 %v528_v31, %v500_v36 }
  0xde   : > { %v568_v51 = vmul.f32 %v529_v43, %v529_v43  ;;  %v554_v55 = vadd.f32 %v553_v50, %v529_v43 }
  0xdf   : > { %v530_v53 = vpop.f32.mrf.mxu2 }
  0xe0   : > { %v575_v57 = vadd.f32 %v574_v54, %v568_v51 }
  0xe1   : > { %v501_v48 = vpop.f32.mrf.mxu1 }
  0xe2   : > { %v502_v52 = vadd.f32 %v501_v48, %v472_v47 }
  0xe4   : > { %v531_v56 = vadd.f32 %v530_v53, %v502_v52 }
  0xe6   : > { %v867_v58 = vpack.c.bf16 %v531_v56, %v529_v43  ;;  %v555_v59 = vadd.f32 %v554_v55, %v531_v56  ;;  %v569_v60 = vmul.f32 %v531_v56, %v531_v56 }
  0xe8   : > { %871 = vst [vmem:[%s1031_s15 + $0x18] sm:$0xff] %v867_v58   ;;  %v556_v61 = vrot.slane %v555_v59, 4  ;;  %v576_v62 = vadd.f32 %v575_v57, %v569_v60 }
  0xea   : > { %v557_v63 = vadd.f32 %v556_v61, %v555_v59  ;;  %v577_v0 = vrot.slane %v576_v62, 4 }
  0xec   : > { %v558_v1 = vrot.slane %v557_v63, 2  ;;  %v578_v2 = vadd.f32 %v577_v0, %v576_v62 }
  0xee   : > { %v559_v3 = vadd.f32 %v558_v1, %v557_v63  ;;  %v579_v4 = vrot.slane %v578_v2, 2 }
  0xf0   : > { %v560_v5 = vrot.slane %v559_v3, 1  ;;  %v580_v6 = vadd.f32 %v579_v4, %v578_v2 }
  0xf2   : > { %v581_v7 = vrot.slane %v580_v6, 1  ;;  %v561_v8 = vadd.f32 %v560_v5, %v559_v3 }
  0xf4   : > { %v582_v9 = vadd.f32 %v581_v7, %v580_v6 }
  0xf6   : > { %v584_v10 = vsel %vm583_vm2, %v561_v8, %v582_v9 }
  0xf7   : > { %585 = vst [vmem:[%s187_s18] sm:$0x3] %v584_v10 }
  0xf8 PF: > { %s14_s12 = sadd.s32 1, %s895_s12  }
  0xf9   : > { %p11_p5 = scmp.ge.s32.totalorder %s14_s12, 4  }
  0xfb   :  { %13 = sbr.rel (!%p11_p5) target bundleno = 1 (0x1), region = 70 }

// kernel: _forward.3
= control target key start
LH: loop header
LB: loop body
LE: loop exit
PB: predicated region body
PF: predicated region fallthrough
CT: control target
= control target key end

     0   :  { %s1362_s12 = smov 0   ;;  %s2003_s0 = inlined_call_operand.vmem [shape: bf16[8,16,128], index: 0, kind: input, shape index: {}]   ;;  %s2004_s1 = inlined_call_operand.vmem [shape: f32[1,128], index: 1, kind: input, shape index: {}]   ;;  %s2005_s2 = inlined_call_operand.vmem [shape: f32[1,128], index: 2, kind: input, shape index: {}]   ;;  %s2006_s3 = inlined_call_operand.vmem [shape: f32[8,4,128], index: 3, kind: output, shape index: {}]  }
   0x1 LB: > { %s1274_s13 = sadd.s32 4294967295, %s1335_s12   ;;  %p1278_p0 = scmp.ge.s32.totalorder %s1335_s12, 1  ;;  %s1335_s12 = sphi %s1362_s12, %s13_s12  }
   0x2   : > { %p139_p1 = scmp.lt.s32.totalorder %s1335_s12, 3 }
   0x4   : > { %p140_p2 = pnand %p1278_p0, %p139_p1 }
   0x6   : > { %143 = sbr.rel (%p140_p2) target bundleno = 562 (0x232), region = 32 }
   0xb   : > { %s1279_s14 = sshll.u32 %s1274_s13, 2  ;;  %v1327_v0 = vld [vmem:[%s2004_s1] ss:$0 sm:$0xff]  ;;  %v1337_v2 = vmov 1935823168   ;;  %vm300_vm0 = vcmask 1040384  }
   0xc   : > { %p165_p3 = scmp.lt.s32.totalorder %s1279_s14, 7  ;;  %v226_v3 = vunpack.c.l.s4 %v1337_v2  ;;  %v1328_v7 = vld [vmem:[%s2005_s2] ss:$0 sm:$0xff]  ;;  %vm345_vm1 = vcmask 1041408   ;;  %vm347_vm2 = vcmask 1043458   ;;  %s1338_s23 = smov 64  }
   0xd   : > { %vm440_vm3 = vcmask 1047556   ;;  %s1340_s24 = smov 96   ;;  %s1341_s25 = smov 32   ;;  %vm1199_vm4 = vcmask 261120   ;;  %vm1204_vm5 = vcmask 523264   ;;  %vm1209_vm6 = vcmask 785408  }
   0xe   : > { %s2011_s14 = smov (!%p165_p3, %s1279_s14), 7  ;;  %v1386_v14 = vunpack.c.0.s8 %v226_v3 }
   0xf   : > { %s1294_s15 = sshll.u32 %s2011_s14, 3  ;;  %s1283_s26 = sshll.u32 %s2011_s14, 2 }
  0x10   : > { %s1376_s18 = scalar_lea.vmem %s2003_s0, %s1294_s15  ;;  %s175_s29 = scalar_lea.vmem %s2006_s3, %s1283_s26 }
  0x11   : > { %v1311_v1 = vld [vmem:[%s1376_s18 + $0x8] sm:$0xff]   ;;  %v1296_v4 = vld [vmem:[%s1376_s18] sm:$0xff]   ;;  %v1313_v19 = vld [vmem:[%s1376_s18 + $0x18] sm:$0xff]  }
  0x12   : > { %v1301_v5 = vunpack.c.l.bf16 %v1311_v1  ;;  %v1302_v6 = vunpack.c.h.bf16 %v1311_v1  ;;  %v1297_v8 = vunpack.c.l.bf16 %v1296_v4  ;;  %v1298_v9 = vunpack.c.h.bf16 %v1296_v4  ;;  %v1312_v36 = vld [vmem:[%s1376_s18 + $0x10] sm:$0xff]  }
  0x13   : > { %v1309_v24 = vunpack.c.l.bf16 %v1313_v19  ;;  %v1310_v25 = vunpack.c.h.bf16 %v1313_v19  ;;  %v1305_v37 = vunpack.c.l.bf16 %v1312_v36  ;;  %v1306_v38 = vunpack.c.h.bf16 %v1312_v36 }
  0x14   : > { %v199_v10 = vmul.f32 %v1327_v0, %v1301_v5  ;;  %v200_v11 = vmul.f32 %v1327_v0, %v1302_v6  ;;  %v197_v12 = vmul.f32 %v1327_v0, %v1297_v8  ;;  %v198_v13 = vmul.f32 %v1327_v0, %v1298_v9 }
  0x15   : > { %v203_v30 = vmul.f32 %v1327_v0, %v1309_v24  ;;  %v204_v31 = vmul.f32 %v1327_v0, %v1310_v25  ;;  %v201_v41 = vmul.f32 %v1327_v0, %v1305_v37  ;;  %v202_v42 = vmul.f32 %v1327_v0, %v1306_v38 }
  0x16   : > { %v211_v15 = vadd.f32 %v1328_v7, %v199_v10  ;;  %v212_v16 = vadd.f32 %v1328_v7, %v200_v11  ;;  %v209_v17 = vadd.f32 %v1328_v7, %v197_v12  ;;  %v210_v18 = vadd.f32 %v1328_v7, %v198_v13 }
  0x17   : > { %v215_v32 = vadd.f32 %v1328_v7, %v203_v30  ;;  %v216_v33 = vadd.f32 %v1328_v7, %v204_v31  ;;  %v213_v46 = vadd.f32 %v1328_v7, %v201_v41  ;;  %v214_v47 = vadd.f32 %v1328_v7, %v202_v42 }
  0x18   : > { %v219_v20 = vmax.f32 %v211_v15, 0.0  ;;  %v220_v21 = vmax.f32 %v212_v16, 0.0  ;;  %v217_v22 = vmax.f32 %v209_v17, 0.0  ;;  %v218_v23 = vmax.f32 %v210_v18, 0.0 }
  0x19   : > { %v223_v34 = vmax.f32 %v215_v32, 0.0  ;;  %v224_v35 = vmax.f32 %v216_v33, 0.0  ;;  %v221_v59 = vmax.f32 %v213_v46, 0.0  ;;  %v222_v60 = vmax.f32 %v214_v47, 0.0 }
  0x1a   : > { %v236_v26 = vperm.slane %v219_v20, %v1386_v14  ;;  %v240_v27 = vperm.slane %v220_v21, %v1386_v14  ;;  %v228_v28 = vperm.slane %v217_v22, %v1386_v14  ;;  %v1393_v29 = vperm.slane %v218_v23, %v1386_v14 }
  0x1b   : > { %v1398_v39 = vperm.slane %v223_v34, %v1386_v14  ;;  %v256_v43 = vperm.slane %v224_v35, %v1386_v14  ;;  %v244_v4 = vperm.slane %v221_v59, %v1386_v14  ;;  %v248_v7 = vperm.slane %v222_v60, %v1386_v14 }
  0x1c   : > { %271 = vst [vmem:[#allocation1 + $0x20] ss:$4 sm:$0xff] %v236_v26  ;;  %v311_v40 = vrot.slane %v236_v26, 4  ;;  %v309_v50 = vrot.slane %v228_v28, 4  ;;  %v312_v0 = vrot.slane %v240_v27, 4  ;;  %v310_v6 = vrot.slane %v1393_v29, 4 }
  0x1d   : > { %273 = vst [vmem:[#allocation1 + $0x21] ss:$4 sm:$0xff] %v240_v27  ;;  %v316_v20 = vrot.slane %v256_v43, 4  ;;  %v315_v24 = vrot.slane %v1398_v39, 4  ;;  %v314_v42 = vrot.slane %v248_v7, 4 }
  0x1e   : > { %265 = vst [vmem:[#allocation1] ss:$4 sm:$0xff] %v228_v28  ;;  %v327_v51 = vmax.f32 %v236_v26, %v311_v40  ;;  %v325_v63 = vmax.f32 %v228_v28, %v309_v50  ;;  %v328_v11 = vmax.f32 %v240_v27, %v312_v0  ;;  %v326_v16 = vmax.f32 %v1393_v29, %v310_v6 }
  0x1f   : > { %267 = vst [vmem:[#allocation1 + $0x1] ss:$4 sm:$0xff] %v1393_v29  ;;  %v313_v26 = vrot.slane %v244_v4, 4  ;;  %v332_v29 = vmax.f32 %v256_v43, %v316_v20  ;;  %v331_v34 = vmax.f32 %v1398_v39, %v315_v24 }
  0x21   : > { %v329_v37 = vmax.f32 %v244_v4, %v313_v26 }
  0x24   : > { %v274_v44 = vld.sshfl [vmem:[#allocation1 + $0x30] sm:$0xff pattern:$0x73625140]  ;;  %v275_v45 = vld.sshfl [vmem:[#allocation1 + $0x38] sm:$0xff pattern:$0x73625140] }
  0x25   : > { %v286_v48 = vrot.slane %v274_v44, 7  ;;  %v287_v49 = vrot.slane %v275_v45, 7  ;;  %280 = vst [vmem:[#allocation1 + $0x20] ss:$4 sm:$0xff] %v1398_v39  ;;  %v330_v39 = vmax.f32 %v248_v7, %v314_v42 }
  0x26   : > { %v268_v52 = vld.sshfl [vmem:[#allocation1 + $0x10] sm:$0xff pattern:$0x73625140]  ;;  %v269_v53 = vld.sshfl [vmem:[#allocation1 + $0x18] sm:$0xff pattern:$0x73625140] }
  0x27   : > { %v303_v54 = vsel %vm300_vm0, 0.0, %v286_v48  ;;  %v304_v55 = vsel %vm300_vm0, 0.0, %v287_v49  ;;  %v284_v56 = vrot.slane %v268_v52, 7  ;;  %v285_v57 = vrot.slane %v269_v53, 7  ;;  %281 = vst [vmem:[#allocation1 + $0x21] ss:$4 sm:$0xff] %v256_v43 }
  0x28   : > { %v342_v58 = vrot.slane %v304_v55, 6  ;;  %276 = vst [vmem:[#allocation1] ss:$4 sm:$0xff] %v244_v4  ;;  %v1339_v49 = vmov 1934713408  }
  0x29   : > { %v301_v61 = vsel %vm300_vm0, 0.0, %v284_v56  ;;  %v302_v62 = vsel %vm300_vm0, 0.0, %v285_v57  ;;  %277 = vst [vmem:[#allocation1 + $0x1] ss:$4 sm:$0xff] %v248_v7  ;;  %v443_v50 = vunpack.c.l.s4 %v1339_v49 }
  0x2a   : > { %v350_v1 = vsel %vm345_vm1, %v303_v54, %v342_v58  ;;  %v341_v2 = vrot.slane %v302_v62, 6  ;;  %v351_v3 = vsel %vm347_vm2, %v303_v54, %v342_v58 }
  0x2b   : > { %v1409_v5 = vmax.f32 %v327_v51, %v350_v1  ;;  %v352_v12 = vrot.slane %v351_v3, 2  ;;  %v1453_v51 = vunpack.c.0.s8 %v443_v50 }
  0x2c   : > { %v346_v8 = vsel %vm345_vm1, %v301_v61, %v341_v2  ;;  %v348_v9 = vsel %vm347_vm2, %v301_v61, %v341_v2 }
  0x2d   : > { %403 = vrot.lane.b32.xlu1 %v1409_v5, %s1338_s23  ;;  %v367_v10 = vmax.f32 %v325_v63, %v346_v8  ;;  %v349_v14 = vrot.slane %v348_v9, 2  ;;  %v1419_v19 = vmax.f32 %v328_v11, %v352_v12  ;;  %v385_v0 = vrot.slane %v1409_v5, 2 }
  0x2e   : > { %v282_v13 = vld.sshfl [vmem:[#allocation1 + $0x30] sm:$0xff pattern:$0x73625140]  ;;  %v283_v15 = vld.sshfl [vmem:[#allocation1 + $0x38] sm:$0xff pattern:$0x73625140] }
  0x2f   : > { %399 = vrot.lane.b32.xlu0 %v367_v10, %s1338_s23  ;;  %v290_v17 = vrot.slane %v282_v13, 7  ;;  %v291_v18 = vrot.slane %v283_v15, 7  ;;  %v1423_v23 = vmax.f32 %v326_v16, %v349_v14  ;;  %v383_v53 = vrot.slane %v367_v10, 2 }
  0x30   : > { %v278_v27 = vld.sshfl [vmem:[#allocation1 + $0x10] sm:$0xff pattern:$0x73625140]  ;;  %v279_v28 = vld.sshfl [vmem:[#allocation1 + $0x18] sm:$0xff pattern:$0x73625140] }
  0x31   : > { %v307_v21 = vsel %vm300_vm0, 0.0, %v290_v17  ;;  %v308_v22 = vsel %vm300_vm0, 0.0, %v291_v18  ;;  %v288_v31 = vrot.slane %v278_v27, 7  ;;  %v289_v32 = vrot.slane %v279_v28, 7 }
  0x32   : > { %v344_v25 = vrot.slane %v308_v22, 6  ;;  %v384_v6 = vrot.slane %v1423_v23, 2 }
  0x33   : > { %v305_v35 = vsel %vm300_vm0, 0.0, %v288_v31  ;;  %v306_v36 = vsel %vm300_vm0, 0.0, %v289_v32  ;;  %v386_v32 = vrot.slane %v1419_v19, 2 }
  0x34   : > { %v357_v30 = vsel %vm347_vm2, %v307_v21, %v344_v25  ;;  %v356_v38 = vsel %vm345_vm1, %v307_v21, %v344_v25  ;;  %v343_v40 = vrot.slane %v306_v36, 6 }
  0x35   : > { %405 = vrot.lane.b32.xlu1 %v1419_v19, %s1338_s23  ;;  %v358_v33 = vrot.slane %v357_v30, 2  ;;  %v1439_v45 = vmax.f32 %v331_v34, %v356_v38 }
  0x36   : > { %v353_v43 = vsel %vm345_vm1, %v305_v35, %v343_v40  ;;  %v354_v44 = vsel %vm347_vm2, %v305_v35, %v343_v40 }
  0x37   : > { %401 = vrot.lane.b32.xlu0 %v1423_v23, %s1338_s23  ;;  %v1435_v41 = vmax.f32 %v332_v29, %v358_v33  ;;  %v1441_v46 = vmax.f32 %v329_v37, %v353_v43  ;;  %v355_v47 = vrot.slane %v354_v44, 2 }
  0x39   : > { %407 = vrot.lane.b32.xlu2 %v1441_v46, %s1338_s23  ;;  %v1449_v48 = vmax.f32 %v330_v39, %v355_v47  ;;  %v387_v39 = vrot.slane %v1441_v46, 2 }
  0x3d   : > { %413 = vrot.lane.b32.xlu1 %v1435_v41, %s1338_s23 }
  0x3f   : > { %411 = vrot.lane.b32.xlu0 %v1439_v45, %s1338_s23 }
  0x41   : > { %409 = vrot.lane.b32.xlu2 %v1449_v48, %s1338_s23 }
  0x9f   : > { %v404_v52 = vpop.permute.xlu1 %403 }
  0xa0   : > { %v472_v54 = vrot.slane %v404_v52, 4  ;;  %v1286_v1 = vrot.slane %v404_v52, 6 }
  0xa1   : > { %v400_v55 = vpop.permute.xlu0 %399 }
  0xa2   : > { %v473_v56 = vsel %vm440_vm3, %v472_v54, %v1409_v5  ;;  %v439_v57 = vrot.slane %v400_v55, 4  ;;  %v1284_v58 = vrot.slane %v400_v55, 6 }
  0xa3   : > { %v1458_v59 = vperm.slane %v473_v56, %v1453_v51 }
  0xa4   : > { %v441_v60 = vsel %vm440_vm3, %v439_v57, %v367_v10  ;;  %v449_v61 = vsel %vm440_vm3, %v1284_v58, %v383_v53  ;;  %v481_v10 = vsel %vm440_vm3, %v1286_v1, %v385_v0 }
  0xa5   : > { %v1463_v62 = vperm.slane %v441_v60, %v1453_v51  ;;  %v1466_v63 = vperm.slane %v449_v61, %v1453_v51  ;;  %747 = vrot.lane.b32.xlu2 %v1458_v59, %s1340_s24  ;;  %v1496_v17 = vperm.slane %v481_v10, %v1453_v51  ;;  %v478_v28 = vrot.slane %v1458_v59, 4 }
  0xa7   : > { %600 = vst [vmem:[#allocation1] ss:$4 sm:$0xff] %v1463_v62  ;;  %731 = vrot.lane.b32.xlu0 %v1463_v62, %s1340_s24  ;;  %v406_v2 = vpop.permute.xlu1 %405  ;;  %v446_v3 = vrot.slane %v1463_v62, 4  ;;  %v454_v4 = vrot.slane %v1466_v63, 4  ;;  %v486_v26 = vrot.slane %v1496_v17, 4  ;;  %v1537_v35 = vsel %vm440_vm3, 0.0, %v478_v28 }
  0xa8   : > { %602 = vst [vmem:[#allocation1 + $0x1] ss:$4 sm:$0xff] %v1466_v63  ;;  %v488_v7 = vrot.slane %v406_v2, 4  ;;  %v1287_v33 = vrot.slane %v406_v2, 6 }
  0xa9   : > { %v402_v8 = vpop.permute.xlu0 %401  ;;  %v1479_v9 = vsel %vm440_vm3, 0.0, %v446_v3  ;;  %v1482_v5 = vsel %vm440_vm3, 0.0, %v454_v4  ;;  %v1534_v34 = vsel %vm440_vm3, 0.0, %v486_v26 }
  0xaa   : > { %v489_v11 = vsel %vm440_vm3, %v488_v7, %v1419_v19  ;;  %v456_v12 = vrot.slane %v402_v8, 4  ;;  %v1285_v13 = vrot.slane %v402_v8, 6  ;;  %605 = vst [vmem:[#allocation1 + $0x20] ss:$4 sm:$0xff] %v1479_v9  ;;  %v497_v38 = vsel %vm440_vm3, %v1287_v33, %v386_v32 }
  0xab   : > { %v1489_v15 = vperm.slane %v489_v11, %v1453_v51  ;;  %607 = vst [vmem:[#allocation1 + $0x21] ss:$4 sm:$0xff] %v1482_v5  ;;  %v1555_v44 = vperm.slane %v497_v38, %v1453_v51 }
  0xac   : > { %v457_v16 = vsel %vm440_vm3, %v456_v12, %v1423_v23  ;;  %v465_v14 = vsel %vm440_vm3, %v1285_v13, %v384_v6  ;;  %v408_v23 = vpop.permute.xlu2 %407  ;;  %v388_v6 = vrot.slane %v1449_v48, 2 }
  0xad   : > { %v1499_v18 = vperm.slane %v457_v16, %v1453_v51  ;;  %v1502_v20 = vperm.slane %v465_v14, %v1453_v51  ;;  %735 = vrot.lane.b32.xlu2 %v1479_v9, %s1340_s24  ;;  %v494_v21 = vrot.slane %v1489_v15, 4  ;;  %v504_v47 = vrot.slane %v408_v23, 4 }
  0xae   : > { %v1288_v49 = vrot.slane %v408_v23, 6  ;;  %v502_v53 = vrot.slane %v1555_v44, 4  ;;  %v389_v23 = vrot.slane %v1439_v45, 2 }
  0xaf   : > { %v603_v22 = vld.sshfl [vmem:[#allocation1] sm:$0xff pattern:$0x73625140]  ;;  %755 = vrot.lane.b32.xlu0 %v1489_v15, %s1340_s24  ;;  %739 = vrot.lane.b32.xlu1 %v1499_v18, %s1340_s24  ;;  %v462_v24 = vrot.slane %v1499_v18, 4  ;;  %v470_v25 = vrot.slane %v1502_v20, 4  ;;  %v1521_v29 = vsel %vm440_vm3, 0.0, %v494_v21  ;;  %v1572_v55 = vpop.permute.xlu1 %413  ;;  %v505_v56 = vsel %vm440_vm3, %v504_v47, %v1441_v46 }
  0xb0   : > { %609 = vst [vmem:[#allocation1] ss:$4 sm:$0xff] %v1499_v18  ;;  %v513_v57 = vsel %vm440_vm3, %v1288_v49, %v387_v39  ;;  %v651_v61 = vrot.slane %v603_v22, 7  ;;  %v552_v1 = vrot.slane %v1572_v55, 4  ;;  %v1589_v2 = vsel %vm440_vm3, 0.0, %v502_v53 }
  0xb1   : > { %610 = vst [vmem:[#allocation1 + $0x1] ss:$4 sm:$0xff] %v1502_v20  ;;  %v1517_v27 = vsel %vm440_vm3, 0.0, %v462_v24  ;;  %v1526_v31 = vsel %vm440_vm3, 0.0, %v470_v25  ;;  %v1545_v37 = vpop.permute.xlu0 %411  ;;  %v1592_v46 = vperm.slane %v505_v56, %v1453_v51  ;;  %v1595_v3 = vperm.slane %v513_v57, %v1453_v51 }
  0xb2   : > { %v1523_v30 = vld.sshfl [vmem:[#allocation1 + $0x20] sm:$0xff pattern:$0x73625140]  ;;  %v536_v42 = vrot.slane %v1545_v37, 4  ;;  %v553_v8 = vsel %vm440_vm3, %v552_v1, %v1435_v41  ;;  %v1290_v25 = vrot.slane %v1545_v37, 6  ;;  %v1291_v39 = vrot.slane %v1572_v55, 6 }
  0xb3   : > { %612 = vst [vmem:[#allocation1 + $0x20] ss:$4 sm:$0xff] %v1517_v27  ;;  %v518_v10 = vrot.slane %v1595_v3, 4  ;;  %v510_v13 = vrot.slane %v1592_v46, 4  ;;  %v1615_v16 = vperm.slane %v553_v8, %v1453_v51  ;;  %v652_v37 = vrot.slane %v1523_v30, 7 }
  0xb4   : > { %613 = vst [vmem:[#allocation1 + $0x21] ss:$4 sm:$0xff] %v1526_v31  ;;  %v410_v19 = vpop.permute.xlu2 %409  ;;  %v537_v50 = vsel %vm440_vm3, %v536_v42, %v1439_v45  ;;  %v545_v45 = vsel %vm440_vm3, %v1290_v25, %v389_v23  ;;  %v390_v30 = vrot.slane %v1435_v41, 2 }
  0xb5   : > { %759 = vrot.lane.b32.xlu2 %v1521_v29, %s1340_s24  ;;  %v520_v43 = vrot.slane %v410_v19, 4  ;;  %v1579_v58 = vperm.slane %v537_v50, %v1453_v51  ;;  %v1289_v7 = vrot.slane %v410_v19, 6  ;;  %v1620_v14 = vsel %vm440_vm3, 0.0, %v518_v10 }
  0xb6   : > { %v1628_v22 = vsel %vm440_vm3, 0.0, %v510_v13  ;;  %v1652_v19 = vperm.slane %v545_v45, %v1453_v51  ;;  %v558_v47 = vrot.slane %v1615_v16, 4  ;;  %v561_v41 = vsel %vm440_vm3, %v1291_v39, %v390_v30 }
  0xb7   : > { %753 = vrot.lane.b32.xlu0 %v1534_v34, %s1340_s24  ;;  %751 = vrot.lane.b32.xlu1 %v1537_v35, %s1340_s24  ;;  %v521_v52 = vsel %vm440_vm3, %v520_v43, %v1449_v48  ;;  %v542_v4 = vrot.slane %v1579_v58, 4  ;;  %v529_v48 = vsel %vm440_vm3, %v1289_v7, %v388_v6 }
  0xb8   : > { %v1543_v36 = vld.sshfl [vmem:[#allocation1] sm:$0xff pattern:$0x73625140]  ;;  %v1583_v60 = vperm.slane %v521_v52, %v1453_v51  ;;  %v1632_v24 = vperm.slane %v529_v48, %v1453_v51  ;;  %v550_v43 = vrot.slane %v1652_v19, 4  ;;  %v1676_v55 = vsel %vm440_vm3, 0.0, %v558_v47 }
  0xb9   : > { %615 = vst [vmem:[#allocation1] ss:$4 sm:$0xff] %v1458_v59  ;;  %v1610_v12 = vsel %vm440_vm3, 0.0, %v542_v4  ;;  %v653_v52 = vrot.slane %v1543_v36, 7  ;;  %v1683_v36 = vperm.slane %v561_v41, %v1453_v51 }
  0xba   : > { %616 = vst [vmem:[#allocation1 + $0x1] ss:$4 sm:$0xff] %v1496_v17  ;;  %v526_v26 = vrot.slane %v1583_v60, 4  ;;  %v534_v32 = vrot.slane %v1632_v24, 4  ;;  %v1671_v53 = vsel %vm440_vm3, 0.0, %v550_v43 }
  0xbb   : > { %v1550_v40 = vld.sshfl [vmem:[#allocation1 + $0x20] sm:$0xff pattern:$0x73625140]  ;;  %2008 = vst [vmem:[#allocation2_spill] sm:$0xff] %v1683_v36 }
  0xbc   : > { %618 = vst [vmem:[#allocation1 + $0x20] ss:$4 sm:$0xff] %v1537_v35  ;;  %v1645_v33 = vsel %vm440_vm3, 0.0, %v526_v26  ;;  %v1655_v42 = vsel %vm440_vm3, 0.0, %v534_v32  ;;  %v654_v49 = vrot.slane %v1550_v40, 7 }
  0xbd   : > { %619 = vst [vmem:[#allocation1 + $0x21] ss:$4 sm:$0xff] %v1534_v34  ;;  %745 = vrot.lane.b32.xlu2 %v1526_v31, %s1340_s24 }
  0xbf   : > { %743 = vrot.lane.b32.xlu0 %v1517_v27, %s1340_s24  ;;  %737 = vrot.lane.b32.xlu1 %v1482_v5, %s1340_s24 }
  0xc1   : > { %v1570_v54 = vld.sshfl [vmem:[#allocation1] sm:$0xff pattern:$0x73625140] }
  0xc2   : > { %621 = vst [vmem:[#allocation1] ss:$4 sm:$0xff] %v1489_v15  ;;  %v655_v1 = vrot.slane %v1570_v54, 7 }
  0xc3   : > { %622 = vst [vmem:[#allocation1 + $0x1] ss:$4 sm:$0xff] %v1555_v44 }
  0xc4   : > { %v1585_v0 = vld.sshfl [vmem:[#allocation1 + $0x20] sm:$0xff pattern:$0x73625140] }
  0xc5   : > { %624 = vst [vmem:[#allocation1 + $0x20] ss:$4 sm:$0xff] %v1521_v29  ;;  %667 = vrot.lane.b32.xlu2 %v651_v61, %s1340_s24  ;;  %v566_v61 = vrot.slane %v1683_v36, 4  ;;  %v656_v4 = vrot.slane %v1585_v0, 7 }
  0xc6   : > { %625 = vst [vmem:[#allocation1 + $0x21] ss:$4 sm:$0xff] %v1589_v2 }
  0xc7   : > { %763 = vrot.lane.b32.xlu0 %v1592_v46, %s1340_s24  ;;  %771 = vrot.lane.b32.xlu1 %v1583_v60, %s1340_s24  ;;  %v1695_v7 = vsel %vm440_vm3, 0.0, %v566_v61 }
  0xca   : > { %v623_v11 = vld.sshfl [vmem:[#allocation1] sm:$0xff pattern:$0x73625140] }
  0xcb   : > { %627 = vst [vmem:[#allocation1] ss:$4 sm:$0xff] %v1592_v46  ;;  %v657_v56 = vrot.slane %v623_v11, 7 }
  0xcc   : > { %628 = vst [vmem:[#allocation1 + $0x1] ss:$4 sm:$0xff] %v1595_v3 }
  0xcd   : > { %v1622_v21 = vld.sshfl [vmem:[#allocation1 + $0x20] sm:$0xff pattern:$0x73625140]  ;;  %783 = vrot.lane.b32.xlu2 %v1610_v12, %s1340_s24 }
  0xce   : > { %631 = vst [vmem:[#allocation1 + $0x21] ss:$4 sm:$0xff] %v1620_v14  ;;  %v658_v0 = vrot.slane %v1622_v21, 7 }
  0xcf   : > { %779 = vrot.lane.b32.xlu0 %v1579_v58, %s1340_s24  ;;  %787 = vrot.lane.b32.xlu1 %v1615_v16, %s1340_s24  ;;  %630 = vst [vmem:[#allocation1 + $0x20] ss:$4 sm:$0xff] %v1628_v22 }
  0xd3   : > { %v629_v28 = vld.sshfl [vmem:[#allocation1] sm:$0xff pattern:$0x73625140] }
  0xd4   : > { %633 = vst [vmem:[#allocation1] ss:$4 sm:$0xff] %v1583_v60  ;;  %v659_v8 = vrot.slane %v629_v28, 7 }
  0xd5   : > { %634 = vst [vmem:[#allocation1 + $0x1] ss:$4 sm:$0xff] %v1632_v24  ;;  %775 = vrot.lane.b32.xlu2 %v1645_v33, %s1340_s24 }
  0xd6   : > { %v632_v38 = vld.sshfl [vmem:[#allocation1 + $0x20] sm:$0xff pattern:$0x73625140] }
  0xd7   : > { %669 = vrot.lane.b32.xlu0 %v652_v37, %s1340_s24  ;;  %767 = vrot.lane.b32.xlu1 %v1628_v22, %s1340_s24  ;;  %636 = vst [vmem:[#allocation1 + $0x20] ss:$4 sm:$0xff] %v1645_v33  ;;  %v660_v11 = vrot.slane %v632_v38, 7 }
  0xd8   : > { %637 = vst [vmem:[#allocation1 + $0x21] ss:$4 sm:$0xff] %v1655_v42 }
  0xdc   : > { %v635_v50 = vld.sshfl [vmem:[#allocation1] sm:$0xff pattern:$0x73625140] }
  0xdd   : > { %639 = vst [vmem:[#allocation1] ss:$4 sm:$0xff] %v1579_v58  ;;  %673 = vrot.lane.b32.xlu2 %v654_v49, %s1340_s24  ;;  %v661_v54 = vrot.slane %v635_v50, 7 }
  0xde   : > { %640 = vst [vmem:[#allocation1 + $0x1] ss:$4 sm:$0xff] %v1652_v19 }
  0xdf   : > { %791 = vrot.lane.b32.xlu0 %v1676_v55, %s1340_s24  ;;  %671 = vrot.lane.b32.xlu1 %v653_v52, %s1340_s24  ;;  %v638_v40 = vld.sshfl [vmem:[#allocation1 + $0x20] sm:$0xff pattern:$0x73625140] }
  0xe0   : > { %642 = vst [vmem:[#allocation1 + $0x20] ss:$4 sm:$0xff] %v1610_v12  ;;  %v662_v13 = vrot.slane %v638_v40, 7 }
  0xe1   : > { %643 = vst [vmem:[#allocation1 + $0x21] ss:$4 sm:$0xff] %v1671_v53 }
  0xe5   : > { %v641_v57 = vld.sshfl [vmem:[#allocation1] sm:$0xff pattern:$0x73625140]  ;;  %679 = vrot.lane.b32.xlu2 %v657_v56, %s1340_s24 }
  0xe6   : > { %645 = vst [vmem:[#allocation1] ss:$4 sm:$0xff] %v1615_v16  ;;  %v663_v10 = vrot.slane %v641_v57, 7 }
  0xe7   : > { %646 = vst [vmem:[#allocation1 + $0x1] ss:$4 sm:$0xff] %v1683_v36  ;;  %675 = vrot.lane.b32.xlu0 %v655_v1, %s1340_s24  ;;  %677 = vrot.lane.b32.xlu1 %v656_v4, %s1340_s24 }
  0xe8   : > { %v644_v6 = vld.sshfl [vmem:[#allocation1 + $0x20] sm:$0xff pattern:$0x73625140] }
  0xe9   : > { %648 = vst [vmem:[#allocation1 + $0x20] ss:$4 sm:$0xff] %v1676_v55  ;;  %v664_v26 = vrot.slane %v644_v6, 7 }
  0xea   : > { %649 = vst [vmem:[#allocation1 + $0x21] ss:$4 sm:$0xff] %v1695_v7 }
  0xed   : > { %687 = vrot.lane.b32.xlu2 %v661_v54, %s1340_s24 }
  0xee   : > { %v647_v23 = vld.sshfl [vmem:[#allocation1] sm:$0xff pattern:$0x73625140] }
  0xef   : > { %681 = vrot.lane.b32.xlu0 %v658_v0, %s1340_s24  ;;  %683 = vrot.lane.b32.xlu1 %v659_v8, %s1340_s24  ;;  %v665_v21 = vrot.slane %v647_v23, 7 }
  0xf1   : > { %v650_v48 = vld.sshfl [vmem:[#allocation1 + $0x20] sm:$0xff pattern:$0x73625140] }
  0xf2   : > { %v666_v25 = vrot.slane %v650_v48, 7 }
  0xf5   : > { %691 = vrot.lane.b32.xlu2 %v663_v10, %s1340_s24 }
  0xf7   : > { %685 = vrot.lane.b32.xlu0 %v660_v11, %s1340_s24  ;;  %689 = vrot.lane.b32.xlu1 %v662_v13, %s1340_s24 }
  0xfd   : > { %697 = vrot.lane.b32.xlu2 %v666_v25, %s1340_s24 }
  0xff   : > { %695 = vrot.lane.b32.xlu0 %v665_v21, %s1340_s24  ;;  %693 = vrot.lane.b32.xlu1 %v664_v26, %s1340_s24  ;;  %v1709_v28 = vpop.permute.xlu2 %747 }
 0x105   : > { %733 = vrot.lane.b32.xlu2 %v1466_v63, %s1340_s24 }
 0x107   : > { %741 = vrot.lane.b32.xlu0 %v1502_v20, %s1340_s24  ;;  %761 = vrot.lane.b32.xlu1 %v1589_v2, %s1340_s24  ;;  %v736_v32 = vpop.permute.xlu2 %735 }
 0x108   : > { %v829_v54 = vmax.f32 %v1479_v9, %v736_v32 }
 0x10d   : > { %757 = vrot.lane.b32.xlu2 %v1555_v44, %s1340_s24 }
 0x10f   : > { %769 = vrot.lane.b32.xlu0 %v1620_v14, %s1340_s24  ;;  %749 = vrot.lane.b32.xlu1 %v1496_v17, %s1340_s24  ;;  %v1723_v45 = vpop.permute.xlu2 %759 }
 0x115   : > { %785 = vrot.lane.b32.xlu2 %v1671_v53, %s1340_s24 }
 0x117   : > { %793 = vrot.lane.b32.xlu0 %v1695_v7, %s1340_s24  ;;  %777 = vrot.lane.b32.xlu1 %v1655_v42, %s1340_s24  ;;  %v1731_v37 = vpop.permute.xlu2 %745 }
 0x119   : > { %v732_v38 = vpop.permute.xlu0 %731 }
 0x11a   : > { %v827_v48 = vmax.f32 %v1463_v62, %v732_v38 }
 0x11d   : > { %773 = vrot.lane.b32.xlu2 %v1632_v24, %s1340_s24 }
 0x11f   : > { %781 = vrot.lane.b32.xlu0 %v1652_v19, %s1340_s24  ;;  %765 = vrot.lane.b32.xlu1 %v1595_v3, %s1340_s24  ;;  %v668_v30 = vpop.permute.xlu2 %667 }
 0x120   : > { %v1759_v10 = vsel %vm300_vm0, 0.0, %v668_v30 }
 0x121   : > { %v740_v43 = vpop.permute.xlu1 %739  ;;  %v756_v39 = vpop.permute.xlu0 %755  ;;  %v907_v21 = vmax.f32 %v827_v48, %v1759_v10 }
 0x127   : > { %789 = vrot.lane.b32.xlu1 %v1683_v36, %s1340_s24  ;;  %v1741_v47 = vpop.permute.xlu2 %783  ;;  %v831_v36 = vmax.f32 %v1499_v18, %v740_v43 }
 0x129   : > { %v752_v49 = vpop.permute.xlu1 %751  ;;  %v1743_v50 = vpop.permute.xlu0 %753 }
 0x12a   : > { %v837_v18 = vmax.f32 %v1537_v35, %v752_v49  ;;  %v841_v49 = vmax.f32 %v1521_v29, %v1723_v45 }
 0x12f   : > { %v1745_v52 = vpop.permute.xlu2 %775 }
 0x131   : > { %v744_v41 = vpop.permute.xlu0 %743  ;;  %v1747_v40 = vpop.permute.xlu1 %737 }
 0x132   : > { %v833_v9 = vmax.f32 %v1517_v27, %v744_v41 }
 0x137   : > { %v674_v56 = vpop.permute.xlu2 %673 }
 0x138   : > { %v1767_v25 = vsel %vm300_vm0, 0.0, %v674_v56 }
 0x139   : > { %v1749_v57 = vpop.permute.xlu0 %763  ;;  %v1751_v61 = vpop.permute.xlu1 %771  ;;  %v913_v32 = vmax.f32 %v833_v9, %v1767_v25 }
 0x13f   : > { %v680_v1 = vpop.permute.xlu2 %679 }
 0x141   : > { %v1753_v4 = vpop.permute.xlu0 %779  ;;  %v1755_v6 = vpop.permute.xlu1 %787 }
 0x147   : > { %v688_v13 = vpop.permute.xlu2 %687 }
 0x149   : > { %v670_v0 = vpop.permute.xlu0 %669  ;;  %v768_v8 = vpop.permute.xlu1 %767 }
 0x14a   : > { %v1762_v11 = vsel %vm300_vm0, 0.0, %v670_v0 }
 0x14b   : > { %v909_v23 = vmax.f32 %v829_v54, %v1762_v11  ;;  %v947_v54 = vrot.slane %v913_v32, 4 }
 0x14d   : > { %v939_v26 = vrot.slane %v909_v23, 4 }
 0x14f   : > { %v940_v30 = vsel %vm440_vm3, %v939_v26, %v907_v21  ;;  %v692_v41 = vpop.permute.xlu2 %691 }
 0x150   : > { %v1774_v0 = vperm.slane %v940_v30, %v1453_v51 }
 0x151   : > { %v792_v62 = vpop.permute.xlu0 %791  ;;  %v672_v38 = vpop.permute.xlu1 %671 }
 0x152   : > { %1075 = vst [vmem:[#allocation1] ss:$4 sm:$0xff] %v1774_v0  ;;  %v1779_v56 = vsel %vm300_vm0, 0.0, %v672_v38 }
 0x153   : > { %v911_v27 = vmax.f32 %v831_v36, %v1779_v56  ;;  %v835_v36 = vmax.f32 %v1458_v59, %v1709_v28  ;;  %v839_v28 = vmax.f32 %v1489_v15, %v756_v39 }
 0x155   : > { %v948_v48 = vsel %vm440_vm3, %v947_v54, %v911_v27 }
 0x156   : > { %v1784_v23 = vperm.slane %v948_v48, %v1453_v51 }
 0x157   : > { %v698_v54 = vpop.permute.xlu2 %697 }
 0x158   : > { %1077 = vst [vmem:[#allocation1 + $0x1] ss:$4 sm:$0xff] %v1784_v23 }
 0x159   : > { %v676_v43 = vpop.permute.xlu0 %675  ;;  %v678_v21 = vpop.permute.xlu1 %677 }
 0x15a   : > { %v1789_v9 = vsel %vm300_vm0, 0.0, %v676_v43  ;;  %v1792_v26 = vsel %vm300_vm0, 0.0, %v678_v21  ;;  %v1805_v21 = vsel %vm300_vm0, 0.0, %v680_v1  ;;  %v849_v1 = vmax.f32 %v1645_v33, %v1745_v52 }
 0x15b   : > { %v917_v32 = vmax.f32 %v837_v18, %v1792_v26  ;;  %v915_v30 = vmax.f32 %v835_v36, %v1789_v9  ;;  %v919_v36 = vmax.f32 %v839_v28, %v1805_v21 }
 0x15d   : > { %v971_v38 = vrot.slane %v917_v32, 4 }
 0x15f   : > { %v972_v27 = vsel %vm440_vm3, %v971_v38, %v915_v30  ;;  %v1818_v45 = vpop.permute.xlu2 %733  ;;  %v845_v38 = vmax.f32 %v1628_v22, %v768_v8  ;;  %v843_v22 = vmax.f32 %v1592_v46, %v1749_v57 }
 0x160   : > { %v1800_v35 = vperm.slane %v972_v27, %v1453_v51  ;;  %v1824_v27 = vsel %vm300_vm0, 0.0, %v688_v13  ;;  %v857_v13 = vmax.f32 %v1676_v55, %v792_v62  ;;  %v855_v55 = vmax.f32 %v1615_v16, %v1755_v6  ;;  %v1857_v62 = vld.sshfl [vmem:[#allocation1] sm:$0xff pattern:$0x73625140] }
 0x161   : > { %v682_v48 = vpop.permute.xlu0 %681  ;;  %v684_v43 = vpop.permute.xlu1 %683 }
 0x162   : > { %1080 = vst [vmem:[#allocation1 + $0x20] ss:$4 sm:$0xff] %v1800_v35  ;;  %v1809_v59 = vsel %vm300_vm0, 0.0, %v682_v48  ;;  %v1830_v48 = vsel %vm300_vm0, 0.0, %v684_v43 }
 0x163   : > { %v921_v18 = vmax.f32 %v841_v49, %v1809_v59  ;;  %v847_v49 = vmax.f32 %v1583_v60, %v1751_v61  ;;  %v1844_v61 = vsel %vm300_vm0, 0.0, %v698_v54  ;;  %v923_v43 = vmax.f32 %v843_v22, %v1830_v48 }
 0x164   : > { %v853_v54 = vmax.f32 %v1610_v12, %v1741_v47  ;;  %v851_v12 = vmax.f32 %v1579_v58, %v1753_v4  ;;  %v953_v4 = vrot.slane %v1784_v23, 4 }
 0x165   : > { %v979_v32 = vrot.slane %v921_v18, 4  ;;  %v927_v60 = vmax.f32 %v847_v49, %v1824_v27 }
 0x167   : > { %v980_v30 = vsel %vm440_vm3, %v979_v32, %v919_v36  ;;  %v937_v32 = vmax.f32 %v857_v13, %v1844_v61  ;;  %v1870_v16 = vpop.permute.xlu2 %757 }
 0x168   : > { %v1816_v29 = vperm.slane %v980_v30, %v1453_v51 }
 0x169   : > { %v686_v15 = vpop.permute.xlu0 %685  ;;  %v690_v39 = vpop.permute.xlu1 %689  ;;  %v1043_v47 = vrot.slane %v937_v32, 4 }
 0x16a   : > { %1082 = vst [vmem:[#allocation1 + $0x21] ss:$4 sm:$0xff] %v1816_v29  ;;  %v1833_v28 = vsel %vm300_vm0, 0.0, %v686_v15  ;;  %v1836_v33 = vsel %vm300_vm0, 0.0, %v690_v39  ;;  %v1860_v39 = vsel %vm300_vm0, 0.0, %v692_v41  ;;  %v985_v23 = vrot.slane %v1816_v29, 4 }
 0x16b   : > { %v925_v52 = vmax.f32 %v845_v38, %v1833_v28  ;;  %v929_v8 = vmax.f32 %v849_v1, %v1836_v33  ;;  %v931_v41 = vmax.f32 %v851_v12, %v1860_v39  ;;  %v876_v12 = vrot.slane %v1762_v11, 2 }
 0x16c   : > { %v986_v11 = vsel %vm440_vm3, 0.0, %v985_v23  ;;  %v885_v23 = vrot.slane %v1824_v27, 2 }
 0x16d   : > { %v1003_v18 = vrot.slane %v925_v52, 4  ;;  %v1011_v36 = vrot.slane %v929_v8, 4 }
 0x16f   : > { %v1004_v30 = vsel %vm440_vm3, %v1003_v18, %v923_v43  ;;  %v1012_v46 = vsel %vm440_vm3, %v1011_v36, %v927_v60  ;;  %v945_v43 = vrot.slane %v1774_v0, 4  ;;  %v977_v0 = vrot.slane %v1800_v35, 4 }
 0x170   : > { %v1008_v57 = vperm.slane %v1004_v30, %v1453_v51  ;;  %v1016_v1 = vperm.slane %v1012_v46, %v1453_v51  ;;  %v828_v35 = vmax.f32 %v1466_v63, %v1818_v45 }
 0x171   : > { %v696_v38 = vpop.permute.xlu0 %695  ;;  %v694_v15 = vpop.permute.xlu1 %693  ;;  %v1880_v18 = vld.sshfl [vmem:[#allocation1 + $0x20] sm:$0xff pattern:$0x73625140]  ;;  %v946_v46 = vsel %vm440_vm3, 0.0, %v945_v43 }
 0x172   : > { %1084 = vst [vmem:[#allocation1] ss:$4 sm:$0xff] %v1008_v57  ;;  %v1863_v49 = vsel %vm300_vm0, 0.0, %v696_v38  ;;  %v1866_v22 = vsel %vm300_vm0, 0.0, %v694_v15  ;;  %v1891_v38 = vpop.permute.xlu2 %785  ;;  %v878_v15 = vrot.slane %v1767_v25, 2 }
 0x173   : > { %1085 = vst [vmem:[#allocation1 + $0x1] ss:$4 sm:$0xff] %v1016_v1  ;;  %v935_v6 = vmax.f32 %v855_v55, %v1863_v49  ;;  %v933_v52 = vmax.f32 %v853_v54, %v1866_v22  ;;  %v954_v55 = vsel %vm440_vm3, 0.0, %v953_v4 }
 0x175   : > { %v1044_v8 = vsel %vm440_vm3, %v1043_v47, %v935_v6  ;;  %v1035_v60 = vrot.slane %v933_v52, 4  ;;  %v834_v47 = vmax.f32 %v1526_v31, %v1731_v37  ;;  %v1009_v6 = vrot.slane %v1008_v57, 4 }
 0x176   : > { %v1877_v13 = vperm.slane %v1044_v8, %v1453_v51  ;;  %v830_v52 = vmax.f32 %v1482_v5, %v1747_v40  ;;  %v1017_v8 = vrot.slane %v1016_v1, 4  ;;  %v875_v31 = vrot.slane %v1759_v10, 2 }
 0x177   : > { %v1036_v58 = vsel %vm440_vm3, %v1035_v60, %v931_v41  ;;  %v978_v41 = vsel %vm440_vm3, 0.0, %v977_v0  ;;  %v914_v37 = vmax.f32 %v834_v47, %v878_v15  ;;  %v877_v40 = vrot.slane %v1779_v56, 2 }
 0x178   : > { %1088 = vst [vmem:[#allocation1 + $0x21] ss:$4 sm:$0xff] %v1877_v13  ;;  %v1040_v36 = vperm.slane %v1036_v58, %v1453_v51  ;;  %v910_v5 = vmax.f32 %v830_v52, %v876_v12  ;;  %v1010_v63 = vsel %vm440_vm3, 0.0, %v1009_v6  ;;  %v880_v1 = vrot.slane %v1792_v26, 2 }
 0x179   : > { %v742_v32 = vpop.permute.xlu0 %741  ;;  %v762_v30 = vpop.permute.xlu1 %761  ;;  %v908_v58 = vmax.f32 %v828_v35, %v875_v31  ;;  %v1018_v4 = vsel %vm440_vm3, 0.0, %v1017_v8  ;;  %v882_v10 = vrot.slane %v1809_v59, 2  ;;  %v881_v0 = vrot.slane %v1805_v21, 2 }
 0x17a   : > { %1087 = vst [vmem:[#allocation1 + $0x20] ss:$4 sm:$0xff] %v1040_v36  ;;  %v1887_v54 = vld.sshfl [vmem:[#allocation1] sm:$0xff pattern:$0x73625140]  ;;  %v832_v25 = vmax.f32 %v1502_v20, %v742_v32  ;;  %v842_v45 = vmax.f32 %v1589_v2, %v762_v30  ;;  %v838_v20 = vmax.f32 %v1534_v34, %v1743_v50  ;;  %v1041_v56 = vrot.slane %v1040_v36, 4  ;;  %v774_v26 = vpop.permute.xlu2 %773 }
 0x17b   : > { %1102 = vst [vmem:[#allocation1] ss:$4 sm:$0xff] %v946_v46  ;;  %v963_v46 = vrot.slane %v914_v37, 4  ;;  %v955_v2 = vrot.slane %v910_v5, 4  ;;  %v1049_v30 = vrot.slane %v1877_v13, 4  ;;  %v879_v15 = vrot.slane %v1789_v9, 2 }
 0x17c   : > { %1104 = vst [vmem:[#allocation1 + $0x1] ss:$4 sm:$0xff] %v954_v55  ;;  %v912_v32 = vmax.f32 %v832_v25, %v877_v40  ;;  %v922_v12 = vmax.f32 %v842_v45, %v882_v10  ;;  %v918_v34 = vmax.f32 %v838_v20, %v880_v1  ;;  %v886_v59 = vrot.slane %v1836_v33, 2 }
 0x17d   : > { %v956_v50 = vsel %vm440_vm3, %v955_v2, %v908_v58  ;;  %v840_v36 = vmax.f32 %v1555_v44, %v1870_v16  ;;  %v1042_v6 = vsel %vm440_vm3, 0.0, %v1041_v56  ;;  %v848_v21 = vmax.f32 %v1632_v24, %v774_v26 }
 0x17e   : > { %v1050_v52 = vsel %vm440_vm3, 0.0, %v1049_v30  ;;  %v854_v33 = vmax.f32 %v1671_v53, %v1891_v38  ;;  %v960_v44 = vperm.slane %v956_v50, %v1453_v51  ;;  %v995_v16 = vrot.slane %v922_v12, 4 }
 0x17f   : > { %v920_v25 = vmax.f32 %v840_v36, %v881_v0  ;;  %v928_v53 = vmax.f32 %v848_v21, %v885_v23  ;;  %v887_v40 = vrot.slane %v1860_v39, 2  ;;  %v889_v23 = vrot.slane %v1863_v49, 2 }
 0x180   : > { %v961_v12 = vrot.slane %v960_v44, 4 }
 0x181   : > { %v1903_v60 = vpop.permute.xlu0 %769  ;;  %v750_v29 = vpop.permute.xlu1 %749  ;;  %v1905_v43 = vld.sshfl [vmem:[#allocation1 + $0x20] sm:$0xff pattern:$0x73625140] }
 0x182   : > { %1107 = vst [vmem:[#allocation1 + $0x20] ss:$4 sm:$0xff] %v978_v41  ;;  %v836_v55 = vmax.f32 %v1496_v17, %v750_v29  ;;  %v964_v17 = vsel %vm440_vm3, %v963_v46, %v912_v32  ;;  %v888_v41 = vrot.slane %v1866_v22, 2  ;;  %v846_v24 = vmax.f32 %v1620_v14, %v1903_v60 }
 0x183   : > { %1109 = vst [vmem:[#allocation1 + $0x21] ss:$4 sm:$0xff] %v986_v11  ;;  %v1105_v57 = vld.sshfl [vmem:[#allocation1] sm:$0xff pattern:$0x73625140]  ;;  %v968_v29 = vperm.slane %v964_v17, %v1453_v51  ;;  %v884_v22 = vrot.slane %v1833_v28, 2  ;;  %v996_v14 = vsel %vm440_vm3, %v995_v16, %v920_v25 }
 0x184   : > { %1117 = vrot.lane.b32.xlu2 %v1105_v57, %s1341_s25  ;;  %1111 = vst [vmem:[#allocation1] ss:$4 sm:$0xff] %v1010_v63  ;;  %v916_v35 = vmax.f32 %v836_v55, %v879_v15  ;;  %v934_v31 = vmax.f32 %v854_v33, %v888_v41  ;;  %v883_v28 = vrot.slane %v1830_v48, 2  ;;  %v1000_v20 = vperm.slane %v996_v14, %v1453_v51 }
 0x185   : > { %1112 = vst [vmem:[#allocation1 + $0x1] ss:$4 sm:$0xff] %v1018_v4  ;;  %v926_v60 = vmax.f32 %v846_v24, %v884_v22  ;;  %v890_v48 = vrot.slane %v1844_v61, 2  ;;  %v2009_v61 = vld [vmem:[#allocation2_spill] sm:$0xff]  ;;  %v969_v36 = vrot.slane %v968_v29, 4 }
 0x186   : > { %v1051_v4 = vrot.slane %v934_v31, 4 }
 0x187   : > { %v1019_v32 = vrot.slane %v926_v60, 4  ;;  %v970_v21 = vsel %vm440_vm3, 0.0, %v969_v36 }
 0x189   : > { %v794_v47 = vpop.permute.xlu0 %793  ;;  %v778_v13 = vpop.permute.xlu1 %777 }
 0x18a   : > { %v850_v27 = vmax.f32 %v1655_v42, %v778_v13  ;;  %v1110_v9 = vld.sshfl [vmem:[#allocation1 + $0x20] sm:$0xff pattern:$0x73625140]  ;;  %v987_v42 = vrot.slane %v918_v34, 4  ;;  %v858_v46 = vmax.f32 %v1695_v7, %v794_v47 }
 0x18b   : > { %1119 = vrot.lane.b32.xlu0 %v1110_v9, %s1341_s25  ;;  %1114 = vst [vmem:[#allocation1 + $0x20] ss:$4 sm:$0xff] %v1042_v6  ;;  %v962_v6 = vsel %vm440_vm3, 0.0, %v961_v12  ;;  %v1001_v9 = vrot.slane %v1000_v20, 4 }
 0x18c   : > { %v930_v8 = vmax.f32 %v850_v27, %v886_v59  ;;  %1115 = vst [vmem:[#allocation1 + $0x21] ss:$4 sm:$0xff] %v1050_v52  ;;  %v1113_v11 = vld.sshfl [vmem:[#allocation1] sm:$0xff pattern:$0x73625140]  ;;  %v988_v37 = vsel %vm440_vm3, %v987_v42, %v916_v35  ;;  %v938_v55 = vmax.f32 %v858_v46, %v890_v48 }
 0x18d   : > { %1121 = vrot.lane.b32.xlu2 %v1113_v11, %s1341_s25  ;;  %1137 = vst [vmem:[#allocation1] ss:$4 sm:$0xff] %v960_v44  ;;  %v992_v57 = vperm.slane %v988_v37, %v1453_v51  ;;  %v1002_v44 = vsel %vm440_vm3, 0.0, %v1001_v9 }
 0x18e   : > { %v1027_v38 = vrot.slane %v930_v8, 4  ;;  %1139 = vst [vmem:[#allocation1 + $0x1] ss:$4 sm:$0xff] %v968_v29  ;;  %v1059_v34 = vrot.slane %v938_v55, 4 }
 0x18f   : > { %v993_v27 = vrot.slane %v992_v57, 4 }
 0x190   : > { %v1028_v5 = vsel %vm440_vm3, %v1027_v38, %v928_v53 }
 0x191   : > { %v782_v63 = vpop.permute.xlu0 %781  ;;  %v766_v45 = vpop.permute.xlu1 %765  ;;  %v1032_v10 = vperm.slane %v1028_v5, %v1453_v51 }
 0x192   : > { %v852_v1 = vmax.f32 %v1652_v19, %v782_v63  ;;  %v844_v58 = vmax.f32 %v1595_v3, %v766_v45 }
 0x193   : > { %v1116_v56 = vld.sshfl [vmem:[#allocation1 + $0x20] sm:$0xff pattern:$0x73625140]  ;;  %v1033_v52 = vrot.slane %v1032_v10, 4 }
 0x194   : > { %v932_v39 = vmax.f32 %v852_v1, %v887_v40  ;;  %v924_v2 = vmax.f32 %v844_v58, %v883_v28  ;;  %1142 = vst [vmem:[#allocation1 + $0x20] ss:$4 sm:$0xff] %v992_v57 }
 0x195   : > { %1144 = vst [vmem:[#allocation1 + $0x21] ss:$4 sm:$0xff] %v1000_v20  ;;  %1123 = vrot.lane.b32.xlu2 %v1116_v56, %s1341_s25  ;;  %v1140_v3 = vld.sshfl [vmem:[#allocation1] sm:$0xff pattern:$0x73625140]  ;;  %v1034_v16 = vsel %vm440_vm3, 0.0, %v1033_v52 }
 0x196   : > { %v1052_v30 = vsel %vm440_vm3, %v1051_v4, %v932_v39  ;;  %v1020_v19 = vsel %vm440_vm3, %v1019_v32, %v924_v2  ;;  %1152 = vrot.lane.b32.xlu1 %v1140_v3, %s1338_s23  ;;  %1147 = vst [vmem:[#allocation1 + $0x1] ss:$4 sm:$0xff] %v1032_v10 }
 0x197   : > { %v1024_v26 = vperm.slane %v1020_v19, %v1453_v51  ;;  %v1056_v7 = vperm.slane %v1052_v30, %v1453_v51 }
 0x199   : > { %1146 = vst [vmem:[#allocation1] ss:$4 sm:$0xff] %v1024_v26  ;;  %v790_v0 = vpop.permute.xlu1 %789  ;;  %v1025_v49 = vrot.slane %v1024_v26, 4  ;;  %v1057_v24 = vrot.slane %v1056_v7, 4 }
 0x19a   : > { %v856_v15 = vmax.f32 %v2009_v61, %v790_v0 }
 0x19b   : > { %v1026_v41 = vsel %vm440_vm3, 0.0, %v1025_v49  ;;  %v1058_v42 = vsel %vm440_vm3, 0.0, %v1057_v24 }
 0x19c   : > { %v936_v50 = vmax.f32 %v856_v15, %v889_v23  ;;  %v1145_v59 = vld.sshfl [vmem:[#allocation1 + $0x20] sm:$0xff pattern:$0x73625140] }
 0x19d   : > { %1149 = vst [vmem:[#allocation1 + $0x20] ss:$4 sm:$0xff] %v1056_v7 }
 0x19e   : > { %v1060_v47 = vsel %vm440_vm3, %v1059_v34, %v936_v50 }
 0x19f   : > { %v1064_v13 = vperm.slane %v1060_v47, %v1453_v51  ;;  %v994_v51 = vsel %vm440_vm3, 0.0, %v993_v27 }
 0x1a0   : > { %v1148_v17 = vld.sshfl [vmem:[#allocation1] sm:$0xff pattern:$0x73625140] }
 0x1a1   : > { %1156 = vrot.lane.b32.xlu0 %v1148_v17, %s1338_s23  ;;  %1172 = vst [vmem:[#allocation1] ss:$4 sm:$0xff] %v962_v6  ;;  %v1065_v8 = vrot.slane %v1064_v13, 4 }
 0x1a2   : > { %1174 = vst [vmem:[#allocation1 + $0x1] ss:$4 sm:$0xff] %v970_v21 }
 0x1a3   : > { %1150 = vst [vmem:[#allocation1 + $0x21] ss:$4 sm:$0xff] %v1064_v13  ;;  %v1066_v11 = vsel %vm440_vm3, 0.0, %v1065_v8 }
 0x1a9   : > { %1154 = vrot.lane.b32.xlu0 %v1145_v59, %s1338_s23  ;;  %v1175_v33 = vld.sshfl [vmem:[#allocation1] sm:$0xff pattern:$0x73625140] }
 0x1aa   : > { %v1151_v35 = vld.sshfl [vmem:[#allocation1 + $0x20] sm:$0xff pattern:$0x73625140]  ;;  %1187 = vrot.lane.b32.xlu1 %v1175_v33, %s1340_s24  ;;  %1181 = vst [vmem:[#allocation1] ss:$4 sm:$0xff] %v1026_v41 }
 0x1ab   : > { %1158 = vrot.lane.b32.xlu2 %v1151_v35, %s1338_s23  ;;  %1177 = vst [vmem:[#allocation1 + $0x20] ss:$4 sm:$0xff] %v994_v51 }
 0x1ac   : > { %1179 = vst [vmem:[#allocation1 + $0x21] ss:$4 sm:$0xff] %v1002_v44 }
 0x1ad   : > { %1182 = vst [vmem:[#allocation1 + $0x1] ss:$4 sm:$0xff] %v1034_v16 }
 0x1b3   : > { %v1180_v29 = vld.sshfl [vmem:[#allocation1 + $0x20] sm:$0xff pattern:$0x73625140] }
 0x1b4   : > { %1189 = vrot.lane.b32.xlu1 %v1180_v29, %s1340_s24  ;;  %1184 = vst [vmem:[#allocation1 + $0x20] ss:$4 sm:$0xff] %v1058_v42  ;;  %v1183_v22 = vld.sshfl [vmem:[#allocation1] sm:$0xff pattern:$0x73625140] }
 0x1b5   : > { %1185 = vst [vmem:[#allocation1 + $0x21] ss:$4 sm:$0xff] %v1066_v11  ;;  %1191 = vrot.lane.b32.xlu0 %v1183_v22, %s1340_s24 }
 0x1bc   : > { %v1186_v25 = vld.sshfl [vmem:[#allocation1 + $0x20] sm:$0xff pattern:$0x73625140] }
 0x1bd   : > { %1193 = vrot.lane.b32.xlu1 %v1186_v25, %s1340_s24 }
 0x1de   : > { %v1118_v38 = vpop.permute.xlu2 %1117 }
 0x1df   : > { %v1200_v60 = vsel %vm1199_vm4, %v1857_v62, %v1118_v38 }
 0x1e7   : > { %v1122_v14 = vpop.permute.xlu2 %1121 }
 0x1e8   : > { %v1202_v1 = vsel %vm1199_vm4, %v1887_v54, %v1122_v14 }
 0x1ef   : > { %v1124_v28 = vpop.permute.xlu2 %1123 }
 0x1f0   : > { %v1203_v46 = vsel %vm1199_vm4, %v1905_v43, %v1124_v28 }
 0x1fd   : > { %v1120_v53 = vpop.permute.xlu0 %1119 }
 0x1fe   : > { %v1201_v57 = vsel %vm1199_vm4, %v1880_v18, %v1120_v53 }
 0x205   : > { %v1159_v32 = vpop.permute.xlu2 %1158 }
 0x206   : > { %v1208_v18 = vsel %vm1204_vm5, %v1203_v46, %v1159_v32 }
 0x208   : > { %v1153_v37 = vpop.permute.xlu1 %1152 }
 0x209   : > { %v1205_v5 = vsel %vm1204_vm5, %v1200_v60, %v1153_v37 }
 0x213   : > { %v1157_v31 = vpop.permute.xlu0 %1156 }
 0x214   : > { %v1207_v4 = vsel %vm1204_vm5, %v1202_v1, %v1157_v31 }
 0x21b   : > { %v1155_v63 = vpop.permute.xlu0 %1154 }
 0x21c   : > { %v1188_v40 = vpop.permute.xlu1 %1187  ;;  %v1206_v62 = vsel %vm1204_vm5, %v1201_v57, %v1155_v63 }
 0x21d   : > { %v1210_v45 = vsel %vm1209_vm6, %v1205_v5, %v1188_v40 }
 0x21e   : > { %1214 = vst [vmem:[%s175_s29] sm:$0xf] %v1210_v45 }
 0x226   : > { %v1190_v58 = vpop.permute.xlu1 %1189 }
 0x227   : > { %v1211_v20 = vsel %vm1209_vm6, %v1206_v62, %v1190_v58  ;;  %v1192_v10 = vpop.permute.xlu0 %1191 }
 0x228   : > { %1215 = vst [vmem:[%s175_s29 + $0x4] sm:$0xf] %v1211_v20  ;;  %v1212_v56 = vsel %vm1209_vm6, %v1207_v4, %v1192_v10 }
 0x229   : > { %1216 = vst [vmem:[%s175_s29 + $0x8] sm:$0xf] %v1212_v56 }
 0x22f   : > { %v1194_v39 = vpop.permute.xlu1 %1193 }
 0x230   : > { %v1213_v54 = vsel %vm1209_vm6, %v1208_v18, %v1194_v39 }
 0x231   : > { %1217 = vst [vmem:[%s175_s29 + $0xc] sm:$0xf] %v1213_v54 }
 0x232 PF: > { %s13_s12 = sadd.s32 1, %s1335_s12  }
 0x233   : > { %p10_p4 = scmp.ge.s32.totalorder %s13_s12, 4  }
 0x235   :  { %12 = sbr.rel (!%p10_p4) target bundleno = 1 (0x1), region = 80 }

</bundles_post_ra>
